<compile_context>
chip_gen: v5e
topology: v5e:2x2
jax: 0.10.0
libtpu: 0.0.40
codegen_flags: <defaults>
</compile_context>

<pallas_src>
import jax
import jax.numpy as jnp
from jax.experimental import pallas as pl
from jax.experimental.pallas import tpu as pltpu

HIDDEN = 50
_LANE = 128
_MAX_BLOCK_N = 512          # lane-block width once N exceeds a single block


def _ceil_to(a, m):
    return ((a + m - 1) // m) * m


def _rational(x, c_ref, off):
    """Type-(3,2) rational activation, PyTorch `Rational` semantics.

    c_ref is a flat f32 SMEM ref; the 8 coefficients starting at `off` are the
    column-major flattening of the (4,2) torch coeff matrix:
        [a3, a2, a1, a0, b3, b2, b1, b0]
    b3 (off+4) is forced to zero in the torch forward (degree-2 denominator),
    so it is intentionally skipped.
    """
    a3 = c_ref[off + 0]
    a2 = c_ref[off + 1]
    a1 = c_ref[off + 2]
    a0 = c_ref[off + 3]
    # c_ref[off + 4] (x^3 denominator coeff) is zeroed by the torch module.
    b2 = c_ref[off + 5]
    b1 = c_ref[off + 6]
    b0 = c_ref[off + 7]

    # Estrin-style grouping: share x^2, shorten the serial VALU chain.
    x2 = x * x
    p = (a3 * x + a2) * x2 + (a1 * x + a0)
    q = b2 * x2 + (b1 * x + b0)

    # EUP approx reciprocal + one Newton refinement -> ~f32 accuracy, divide
    # moved off the VALU critical path.  Fine for the ReLU-like init
    # (q >= ~1); for trained coeffs with q -> 0, revert to a true divide.
    r = pl.reciprocal(q, approx=True)
    r = r * (2.0 - q * r)
    return p * r


def net_kernel(scal_ref, small_ref, w2_ref, x_ref, o_ref):
    # scal_ref : (17,)   SMEM  = [c1(8) | c2(8) | b3]
    # small_ref: (50,4)  VMEM  columns = [w1, b1, b2, w3^T]
    # w2_ref   : (50,50) VMEM
    # x_ref    : (1,TN)  VMEM  (batch on lanes)
    # o_ref    : (1,TN)  VMEM
    x = x_ref[...]

    w1 = small_ref[:, 0:1]
    b1 = small_ref[:, 1:2]
    b2 = small_ref[:, 2:3]
    w3 = small_ref[:, 3:4]
    b3 = scal_ref[16]

    # fc1 + R1: K=1 contraction == broadcast multiply; stays on the VPU.
    h = w1 * x + b1                                   # (50,1)*(1,TN)+(50,1) -> (50,TN)
    h = _rational(h, scal_ref, 0)

    # fc2 + R2: the only real matmul, (50,50) @ (50,TN) on the MXU.
    h = jnp.dot(w2_ref[...], h, preferred_element_type=jnp.float32) + b2
    h = _rational(h, scal_ref, 8)

    # fc3 (M=1): sublane reduction on the otherwise-idle XLU instead of a
    # second MXU push/drain.  Lane-dense unmasked store.
    o_ref[...] = jnp.sum(w3 * h, axis=0, keepdims=True) + b3


@jax.jit
def net_forward(x, params):
    """x: (N, 1) f32, params in torch layout (W: (out,in), b: (out,), c: (4,2))."""
    w1, b1, w2, b2, w3, b3, c1, c2 = params
    n = x.shape[0]

    # ---- pack small parameters: one VMEM array + one SMEM array -----------
    small = jnp.concatenate(
        [w1.reshape(HIDDEN, 1),            # fc1 weight (in_features == 1)
         b1.reshape(HIDDEN, 1),
         b2.reshape(HIDDEN, 1),
         w3.reshape(1, HIDDEN).T],         # fc3 weight as a column
        axis=1)                            # (50, 4)
    scal = jnp.concatenate(
        [c1.T.reshape(-1), c2.T.reshape(-1), b3.reshape(1)])     # (17,)

    # ---- lane layout: batch on lanes, padded to a dense 128 multiple ------
    if n <= _MAX_BLOCK_N:
        tn = _ceil_to(n, _LANE)            # single lane-dense block
    else:
        tn = _MAX_BLOCK_N                  # lane-blocked batch grid
    n_pad = _ceil_to(n, tn)
    grid_n = n_pad // tn

    xt = x.T                               # (1, N): features on sublanes
    if n_pad != n:
        xt = jnp.pad(xt, ((0, 0), (0, n_pad - n)))

    smem = pl.BlockSpec(memory_space=pltpu.MemorySpace.SMEM)

    # Advisory cost estimate for XLA's scheduler.
    flops = n_pad * (2 * HIDDEN * HIDDEN          # fc2
                     + 4 * HIDDEN                 # fc1 + fc3
                     + 2 * 10 * HIDDEN)           # two rationals, ~10 flops/elem
    cost = pl.CostEstimate(
        flops=flops,
        transcendentals=2 * HIDDEN * n_pad,       # reciprocals
        bytes_accessed=4 * (2 * n_pad + HIDDEN * 4 + HIDDEN * HIDDEN + 17))

    out_t = pl.pallas_call(
        net_kernel,
        out_shape=jax.ShapeDtypeStruct((1, n_pad), jnp.float32),
        grid=(grid_n,),
        in_specs=[
            smem,                                               # scal (whole, SMEM)
            pl.BlockSpec((HIDDEN, 4), lambda i: (0, 0)),        # packed small params
            pl.BlockSpec((HIDDEN, HIDDEN), lambda i: (0, 0)),   # w2
            pl.BlockSpec((1, tn), lambda i: (0, i)),            # x lane block
        ],
        out_specs=pl.BlockSpec((1, tn), lambda i: (0, i)),
        compiler_params=pltpu.CompilerParams(
            dimension_semantics=("parallel",)),                 # v7x: 2 TCs share grid
        cost_estimate=cost,
    )(scal, small, w2, xt)

    return out_t[:, :n].T                  # back to (N, 1)


def init_params(key):
    """Deterministic init mimicking torch.nn.Linear (uniform ±1/sqrt(fan_in)).

    Weights are stored in torch layout (out_features, in_features)."""
    def linear(key, fan_in, fan_out):
        kw, kb = jax.random.split(key)
        bound = 1.0 / jnp.sqrt(jnp.float32(fan_in))
        w = jax.random.uniform(kw, (fan_out, fan_in), jnp.float32, -bound, bound)
        b = jax.random.uniform(kb, (fan_out,), jnp.float32, -bound, bound)
        return w, b

    k1, k2, k3 = jax.random.split(key, 3)
    w1, b1 = linear(k1, 1, HIDDEN)
    w2, b2 = linear(k2, HIDDEN, HIDDEN)
    w3, b3 = linear(k3, HIDDEN, 1)

    # Rational coeffs: same deterministic reset_parameters() values as the
    # torch Rational module (ReLU-like initialization); R1 and R2 independent
    # parameters with identical initial values.
    rational_init = jnp.array(
        [[1.1915, 0.0],
         [1.5957, 2.383],
         [0.5,    0.0],
         [0.0218, 1.0]], dtype=jnp.float32)
    return (w1, b1, w2, b2, w3, b3, rational_init, rational_init)


def net_forward_ref(x, params):
    """Pure-JAX reference (torch-equivalent math) for correctness check."""
    w1, b1, w2, b2, w3, b3, c1, c2 = params

    def rat(h, c):
        # torch forward zeroes c[0,1] (x^3 denominator term).
        c = c.at[0, 1].set(0.0)
        exps = jnp.array([3.0, 2.0, 1.0, 0.0], jnp.float32)
        xp = h[..., None] ** exps            # (..., 4)
        pq = xp @ c                          # (..., 2)
        return pq[..., 0] / pq[..., 1]

    h = x @ w1.T + b1
    h = rat(h, c1)
    h = h @ w2.T + b2
    h = rat(h, c2)
    return h @ w3.T + b3


if __name__ == "__main__":
    # Same workload as the original script: x = linspace(-10, 10, 1000)[:, None].
    # N=1000 exercises the ragged-lane path (pad to 1024) and the 2-block
    # parallel lane grid.  Params are deterministic from PRNGKey(0).
    n = 1000
    x = jnp.linspace(-10.0, 10.0, n, dtype=jnp.float32)[:, None]
    params = init_params(jax.random.PRNGKey(0))

    out = net_forward(x, params)
    out = jax.block_until_ready(out)

    ref = net_forward_ref(x, params)
    assert out.shape == (n, 1)
    assert jnp.allclose(out, ref, atol=1e-4, rtol=1e-4), "mismatch vs reference"

    print("KERNEL_OK")
</pallas_src>

<mosaic_0001>
module attributes {stable_mosaic.version = 11 : i64} {
  func.func @net_kernel(%arg0: i32, %arg1: memref<17xf32, #tpu.memory_space<smem>>, %arg2: memref<50x4xf32, #tpu.memory_space<vmem>>, %arg3: memref<50x50xf32, #tpu.memory_space<vmem>>, %arg4: memref<1x512xf32, #tpu.memory_space<vmem>>, %arg5: memref<1x512xf32, #tpu.memory_space<vmem>>) attributes {dimension_semantics = [#tpu.dimension_semantics<parallel>], iteration_bounds = array<i64: 2>, scalar_prefetch = 0 : i64, scratch_operands = 0 : i64, tpu.core_type = #tpu.core_type<tc>, window_params = [{transform_indices = @transform_0, window_bounds = array<i64: 17>}, {pipeline_mode = #tpu.pipeline_mode<synchronous>, transform_indices = @transform_1, window_bounds = array<i64: 50, 4>}, {pipeline_mode = #tpu.pipeline_mode<synchronous>, transform_indices = @transform_2, window_bounds = array<i64: 50, 50>}, {transform_indices = @transform_3, window_bounds = array<i64: 1, 512>}, {transform_indices = @transform_4, window_bounds = array<i64: 1, 512>}]} {
    %c0 = arith.constant 0 : index
    %c0_0 = arith.constant 0 : index
    %0 = vector.load %arg4[%c0, %c0_0] : memref<1x512xf32, #tpu.memory_space<vmem>>, vector<1x512xf32>
    %c0_1 = arith.constant 0 : index
    %c0_2 = arith.constant 0 : index
    %1 = vector.load %arg2[%c0_1, %c0_2] : memref<50x4xf32, #tpu.memory_space<vmem>>, vector<50x1xf32>
    %c0_3 = arith.constant 0 : index
    %c1 = arith.constant 1 : index
    %2 = vector.load %arg2[%c0_3, %c1] : memref<50x4xf32, #tpu.memory_space<vmem>>, vector<50x1xf32>
    %c0_4 = arith.constant 0 : index
    %c2 = arith.constant 2 : index
    %3 = vector.load %arg2[%c0_4, %c2] : memref<50x4xf32, #tpu.memory_space<vmem>>, vector<50x1xf32>
    %c0_5 = arith.constant 0 : index
    %c3 = arith.constant 3 : index
    %4 = vector.load %arg2[%c0_5, %c3] : memref<50x4xf32, #tpu.memory_space<vmem>>, vector<50x1xf32>
    %c16 = arith.constant 16 : index
    %5 = memref.load %arg1[%c16] : memref<17xf32, #tpu.memory_space<smem>>
    %6 = vector.broadcast %1 : vector<50x1xf32> to vector<50x512xf32>
    %7 = vector.broadcast %0 : vector<1x512xf32> to vector<50x512xf32>
    %8 = arith.mulf %6, %7 : vector<50x512xf32>
    %9 = vector.broadcast %2 : vector<50x1xf32> to vector<50x512xf32>
    %10 = arith.addf %8, %9 : vector<50x512xf32>
    %c0_6 = arith.constant 0 : index
    %11 = memref.load %arg1[%c0_6] : memref<17xf32, #tpu.memory_space<smem>>
    %c1_7 = arith.constant 1 : index
    %12 = memref.load %arg1[%c1_7] : memref<17xf32, #tpu.memory_space<smem>>
    %c2_8 = arith.constant 2 : index
    %13 = memref.load %arg1[%c2_8] : memref<17xf32, #tpu.memory_space<smem>>
    %c3_9 = arith.constant 3 : index
    %14 = memref.load %arg1[%c3_9] : memref<17xf32, #tpu.memory_space<smem>>
    %c5 = arith.constant 5 : index
    %15 = memref.load %arg1[%c5] : memref<17xf32, #tpu.memory_space<smem>>
    %c6 = arith.constant 6 : index
    %16 = memref.load %arg1[%c6] : memref<17xf32, #tpu.memory_space<smem>>
    %c7 = arith.constant 7 : index
    %17 = memref.load %arg1[%c7] : memref<17xf32, #tpu.memory_space<smem>>
    %18 = arith.mulf %10, %10 : vector<50x512xf32>
    %19 = vector.broadcast %11 : f32 to vector<50x512xf32>
    %20 = arith.mulf %19, %10 : vector<50x512xf32>
    %21 = vector.broadcast %12 : f32 to vector<50x512xf32>
    %22 = arith.addf %20, %21 : vector<50x512xf32>
    %23 = arith.mulf %22, %18 : vector<50x512xf32>
    %24 = vector.broadcast %13 : f32 to vector<50x512xf32>
    %25 = arith.mulf %24, %10 : vector<50x512xf32>
    %26 = vector.broadcast %14 : f32 to vector<50x512xf32>
    %27 = arith.addf %25, %26 : vector<50x512xf32>
    %28 = arith.addf %23, %27 : vector<50x512xf32>
    %29 = vector.broadcast %15 : f32 to vector<50x512xf32>
    %30 = arith.mulf %29, %18 : vector<50x512xf32>
    %31 = vector.broadcast %16 : f32 to vector<50x512xf32>
    %32 = arith.mulf %31, %10 : vector<50x512xf32>
    %33 = vector.broadcast %17 : f32 to vector<50x512xf32>
    %34 = arith.addf %32, %33 : vector<50x512xf32>
    %35 = arith.addf %30, %34 : vector<50x512xf32>
    %36 = tpu.reciprocal %35 {approx = true} : vector<50x512xf32> -> vector<50x512xf32>
    %37 = arith.mulf %35, %36 : vector<50x512xf32>
    %cst = arith.constant 2.000000e+00 : f32
    %38 = vector.broadcast %cst : f32 to vector<50x512xf32>
    %39 = arith.subf %38, %37 : vector<50x512xf32>
    %40 = arith.mulf %36, %39 : vector<50x512xf32>
    %41 = arith.mulf %28, %40 : vector<50x512xf32>
    %c0_10 = arith.constant 0 : index
    %c0_11 = arith.constant 0 : index
    %42 = vector.load %arg3[%c0_10, %c0_11] : memref<50x50xf32, #tpu.memory_space<vmem>>, vector<50x50xf32>
    %cst_12 = arith.constant dense<0.000000e+00> : vector<50x512xf32>
    %43 = tpu.matmul %42, %41, %cst_12 {dimension_numbers = #tpu.dot_dimension_numbers<[1], [0], [0], [1], [0, 0, 1, 1], [], []>} : vector<50x50xf32>, vector<50x512xf32>, vector<50x512xf32> -> vector<50x512xf32>
    %44 = vector.broadcast %3 : vector<50x1xf32> to vector<50x512xf32>
    %45 = arith.addf %43, %44 : vector<50x512xf32>
    %c8 = arith.constant 8 : index
    %46 = memref.load %arg1[%c8] : memref<17xf32, #tpu.memory_space<smem>>
    %c9 = arith.constant 9 : index
    %47 = memref.load %arg1[%c9] : memref<17xf32, #tpu.memory_space<smem>>
    %c10 = arith.constant 10 : index
    %48 = memref.load %arg1[%c10] : memref<17xf32, #tpu.memory_space<smem>>
    %c11 = arith.constant 11 : index
    %49 = memref.load %arg1[%c11] : memref<17xf32, #tpu.memory_space<smem>>
    %c13 = arith.constant 13 : index
    %50 = memref.load %arg1[%c13] : memref<17xf32, #tpu.memory_space<smem>>
    %c14 = arith.constant 14 : index
    %51 = memref.load %arg1[%c14] : memref<17xf32, #tpu.memory_space<smem>>
    %c15 = arith.constant 15 : index
    %52 = memref.load %arg1[%c15] : memref<17xf32, #tpu.memory_space<smem>>
    %53 = arith.mulf %45, %45 : vector<50x512xf32>
    %54 = vector.broadcast %46 : f32 to vector<50x512xf32>
    %55 = arith.mulf %54, %45 : vector<50x512xf32>
    %56 = vector.broadcast %47 : f32 to vector<50x512xf32>
    %57 = arith.addf %55, %56 : vector<50x512xf32>
    %58 = arith.mulf %57, %53 : vector<50x512xf32>
    %59 = vector.broadcast %48 : f32 to vector<50x512xf32>
    %60 = arith.mulf %59, %45 : vector<50x512xf32>
    %61 = vector.broadcast %49 : f32 to vector<50x512xf32>
    %62 = arith.addf %60, %61 : vector<50x512xf32>
    %63 = arith.addf %58, %62 : vector<50x512xf32>
    %64 = vector.broadcast %50 : f32 to vector<50x512xf32>
    %65 = arith.mulf %64, %53 : vector<50x512xf32>
    %66 = vector.broadcast %51 : f32 to vector<50x512xf32>
    %67 = arith.mulf %66, %45 : vector<50x512xf32>
    %68 = vector.broadcast %52 : f32 to vector<50x512xf32>
    %69 = arith.addf %67, %68 : vector<50x512xf32>
    %70 = arith.addf %65, %69 : vector<50x512xf32>
    %71 = tpu.reciprocal %70 {approx = true} : vector<50x512xf32> -> vector<50x512xf32>
    %72 = arith.mulf %70, %71 : vector<50x512xf32>
    %cst_13 = arith.constant 2.000000e+00 : f32
    %73 = vector.broadcast %cst_13 : f32 to vector<50x512xf32>
    %74 = arith.subf %73, %72 : vector<50x512xf32>
    %75 = arith.mulf %71, %74 : vector<50x512xf32>
    %76 = arith.mulf %63, %75 : vector<50x512xf32>
    %77 = vector.broadcast %4 : vector<50x1xf32> to vector<50x512xf32>
    %78 = arith.mulf %77, %76 : vector<50x512xf32>
    %cst_14 = arith.constant dense<0.000000e+00> : vector<512xf32>
    %79 = vector.multi_reduction <add>, %78, %cst_14 [0] : vector<50x512xf32> to vector<512xf32>
    %80 = vector.shape_cast %79 : vector<512xf32> to vector<1x512xf32>
    %81 = vector.broadcast %5 : f32 to vector<1x512xf32>
    %82 = arith.addf %80, %81 : vector<1x512xf32>
    %c0_15 = arith.constant 0 : index
    %c0_16 = arith.constant 0 : index
    %83 = vector.load %arg5[%c0_15, %c0_16] : memref<1x512xf32, #tpu.memory_space<vmem>>, vector<1x512xf32>
    tpu.vector_store %arg5[%c0_15, %c0_16], %82 {strides = array<i32>} : memref<1x512xf32, #tpu.memory_space<vmem>>, vector<1x512xf32>,
    return
  }
  func.func @transform_0(%arg0: i32) -> i32 {
    %c0_i32 = arith.constant 0 : i32
    %c0_i32_0 = arith.constant 0 : i32
    return %c0_i32 : i32
  }
  func.func @transform_1(%arg0: i32) -> (i32, i32) {
    %c0_i32 = arith.constant 0 : i32
    %c0_i32_0 = arith.constant 0 : i32
    %c0_i32_1 = arith.constant 0 : i32
    return %c0_i32, %c0_i32_0 : i32, i32
  }
  func.func @transform_2(%arg0: i32) -> (i32, i32) {
    %c0_i32 = arith.constant 0 : i32
    %c0_i32_0 = arith.constant 0 : i32
    %c0_i32_1 = arith.constant 0 : i32
    return %c0_i32, %c0_i32_0 : i32, i32
  }
  func.func @transform_3(%arg0: i32) -> (i32, i32) {
    %c0_i32 = arith.constant 0 : i32
    %c0_i32_0 = arith.constant 0 : i32
    return %c0_i32, %arg0 : i32, i32
  }
  func.func @transform_4(%arg0: i32) -> (i32, i32) {
    %c0_i32 = arith.constant 0 : i32
    %c0_i32_0 = arith.constant 0 : i32
    return %c0_i32, %arg0 : i32, i32
  }
}

</mosaic_0001>

<bundles_post_ra>
// kernel: net_forward.1
= control target key start
LH: loop header
LB: loop body
LE: loop exit
PB: predicated region body
PF: predicated region fallthrough
CT: control target
= control target key end

     0   :  { %9 = vsyncpa [#allocation3], 0  ;;  %s1954_s15 = smov 0   ;;  %s3209_s0 = inlined_call_operand.vmem [shape: f32[17], index: 0, kind: input, shape index: {}]   ;;  %s3210_s1 = inlined_call_operand.vmem [shape: f32[50,4], index: 1, kind: input, shape index: {}]   ;;  %s3211_s2 = inlined_call_operand.vmem [shape: f32[50,50], index: 2, kind: input, shape index: {}]   ;;  %s3212_s3 = inlined_call_operand.vmem [shape: f32[1,1024], index: 3, kind: input, shape index: {}]   ;;  %s3213_s4 = inlined_call_operand.vmem [shape: f32[1,1024], index: 4, kind: output, shape index: {}]  }
   0x1 LB: > { %s1683_s16 = sadd.s32 4294967295, %s1922_s15   ;;  %p1685_p0 = scmp.ge.s32.totalorder %s1922_s15, 1  ;;  %s1922_s15 = sphi %s1954_s15, %s15_s15  }
   0x2   : > { %p135_p1 = scmp.lt.s32.totalorder %s1922_s15, 3  ;;  %s147_s19 = sshll.u32 %s3209_s0, 4  ;;  %s148_s19 = int_to_ptr.vmem [resolvable:$true] %s147_s19 }
   0x3   : > { %p1748_p3 = scmp.eq.s32.totalorder %s1683_s16, 0  ;;  %s1924_s20 = smov [#allocation2]  }
   0x4   : > { %p136_p2 = pnand %p1685_p0, %p135_p1 }
   0x6   : > { %p1744_p4 = pneg %p136_p2  ;;  %174 = sbr.rel (%p136_p2) target bundleno = 543 (0x21f), region = 36 }
   0x8   : > { %p1745_p5 = pnand %p1748_p3, %p1744_p4 }
   0xa   : > { %1747 = dma.vmem_to_smem (!%p1745_p5), %s148_s19, 16, %s1924_s20, [#allocation3]  }
   0xb   : > { %1917 = dma.done.wait (%p1748_p3), [#allocation3], 16  }
   0xc   : > { %1919 = vsyncadd (%p1748_p3), [#allocation3], 4294967280 }
   0xd   : > { %181 = sfence }
   0xe   : > { %v217_v0 = vld [vmem:[%s3210_s1 + $0x30] sm:$0x3]  ;;  %v1925_v1 = vmov 1   ;;  %v1926_v2 = vmov 0   ;;  %v216_v3 = vld [vmem:[%s3210_s1 + $0x28] sm:$0xff]  ;;  %v215_v4 = vld [vmem:[%s3210_s1 + $0x20] sm:$0xff] }
   0xf   : > { %1764 = vset.pattern.permute.xlu1 %v1925_v1  ;;  %1763 = vset.pattern.permute.xlu0 %v1926_v2  ;;  %v214_v5 = vld [vmem:[%s3210_s1 + $0x18] sm:$0xff]  ;;  %v213_v6 = vld [vmem:[%s3210_s1 + $0x10] sm:$0xff]  ;;  %v212_v7 = vld [vmem:[%s3210_s1 + $0x8] sm:$0xff]  ;;  %s1690_s9 = sshll.u32 %s1683_s16, 2  ;;  %s347_s10 = sld [smem:[#allocation2]]  ;;  %vm866_vm0 = vcmask 1041408  }
  0x10   : > { %316 = vperm.xlu1 %1764, %v217_v0   ;;  %251 = vperm.xlu0 %1763, %v217_v0   ;;  %v211_v8 = vld [vmem:[%s3210_s1] sm:$0xff]  ;;  %p201_p6 = scmp.lt.s32.totalorder %s1690_s9, 7  ;;  %s1693_s11 = sld [smem:[#allocation2 + $0x1]]  ;;  %vm844_vm1 = vcmask 408576   ;;  %vm1613_vm2 = vcmask 1040384   ;;  %vm1615_vm3 = vcmask 1042434  }
  0x11   : > { %1766 = vset.pattern.permute.xlu2 %v1925_v1  ;;  %s1694_s17 = sld [smem:[#allocation2 + $0x2]] }
  0x12   : > { %312 = vperm.xlu2 %1766, %v216_v3   ;;  %s3270_s9 = smov (!%p201_p6, %s1690_s9), 7  ;;  %s1696_s18 = sld [smem:[#allocation2 + $0x5]] }
  0x13   : > { %s203_s14 = scalar_lea.vmem %s3212_s3, %s3270_s9  ;;  %s1697_s19 = sld [smem:[#allocation2 + $0x6]] }
  0x14   : > { %v210_v10 = vld [vmem:[%s203_s14] sm:$0xf]  ;;  %s1698_s20 = sld [smem:[#allocation2 + $0x7]] }
  0x15   : > { %v1998_v12 = vperm.slane %v210_v10, 0  ;;  %v2000_v13 = vperm.slane %v210_v10, 1  ;;  %v2004_v18 = vperm.slane %v210_v10, 2  ;;  %v2006_v19 = vperm.slane %v210_v10, 3  ;;  %s2008_s16 = sld [smem:[#allocation2 + $0x3]] }
  0x16   : > { %v2010_v22 = vstv %s347_s10  ;;  %v2014_v24 = vstv %s1693_s11  ;;  %s1736_s25 = sld [smem:[#allocation2 + $0xe]]  ;;  %s208_s10 = scalar_lea.vmem %s3213_s4, %s3270_s9 }
  0x17   : > { %v2016_v25 = vstv %s1694_s17  ;;  %s1735_s26 = sld [smem:[#allocation2 + $0xd]] }
  0x18   : > { %1765 = vset.pattern.permute.xlu1 %v1926_v2  ;;  %246 = vperm.xlu0 %1763, %v216_v3   ;;  %v2018_v26 = vstv %s1696_s18  ;;  %s1737_s27 = sld [smem:[#allocation2 + $0xf]] }
  0x19   : > { %241 = vperm.xlu1 %1765, %v215_v4   ;;  %v2012_v23 = vstv %s1697_s19  ;;  %s1731_s28 = sld [smem:[#allocation2 + $0x8]] }
  0x1a   : > { %1767 = vset.pattern.permute.xlu2 %v1926_v2  ;;  %v2020_v27 = vstv %s1698_s20  ;;  %s1732_s29 = sld [smem:[#allocation2 + $0x9]] }
  0x1b   : > { %236 = vperm.xlu2 %1767, %v214_v5   ;;  %v2040_v50 = vstv %s2008_s16  ;;  %s1733_s30 = sld [smem:[#allocation2 + $0xa]] }
  0x1c   : > { %s1734_s5 = sld [smem:[#allocation2 + $0xb]] }
  0x1d   : > { %s1692_s6 = sld [smem:[#allocation2 + $0x10]] }
  0x20   : > { %1768 = vset.pattern.permute.xlu0 %v1925_v1 }
  0x21   : > { %308 = vperm.xlu0 %1768, %v215_v4   ;;  %231 = vperm.xlu1 %1765, %v213_v6  }
  0x23   : > { %1769 = vset.pattern.permute.xlu2 %v1925_v1 }
  0x24   : > { %304 = vperm.xlu2 %1769, %v214_v5  }
  0x29   : > { %1770 = vset.pattern.permute.xlu0 %v1926_v2  ;;  %226 = vperm.xlu1 %1765, %v212_v7  }
  0x2a   : > { %221 = vperm.xlu0 %1770, %v211_v8  }
  0x2c   : > { %300 = vperm.xlu2 %1769, %v213_v6  }
  0x31   : > { %1771 = vset.pattern.permute.xlu1 %v1925_v1 }
  0x32   : > { %296 = vperm.xlu1 %1771, %v212_v7  }
  0x34   : > { %292 = vperm.xlu2 %1769, %v211_v8  }
  0x6c   : > { %v1990_v9 = vpop.permute.xlu2 %312 }
  0x75   : > { %v237_v11 = vpop.permute.xlu2 %236 }
  0x76   : > { %v275_v28 = vmul.f32 %v1998_v12, %v237_v11  ;;  %v276_v32 = vmul.f32 %v2000_v13, %v237_v11  ;;  %v277_v33 = vmul.f32 %v2004_v18, %v237_v11  ;;  %v278_v36 = vmul.f32 %v2006_v19, %v237_v11 }
  0x7e   : > { %v305_v38 = vpop.permute.xlu2 %304 }
  0x7f   : > { %v2036_v47 = vadd.f32 %v305_v38, %v275_v28  ;;  %v2043_v52 = vadd.f32 %v305_v38, %v276_v32  ;;  %v2045_v53 = vadd.f32 %v305_v38, %v277_v33  ;;  %v2047_v54 = vadd.f32 %v305_v38, %v278_v36 }
  0x82   : > { %v317_v14 = vpop.permute.xlu1 %316  ;;  %v252_v15 = vpop.permute.xlu0 %251 }
  0x83   : > { %v287_v16 = vmul.f32 %v1998_v12, %v252_v15  ;;  %v288_v17 = vmul.f32 %v2000_v13, %v252_v15  ;;  %v289_v29 = vmul.f32 %v2004_v18, %v252_v15  ;;  %v290_v37 = vmul.f32 %v2006_v19, %v252_v15 }
  0x85   : > { %v343_v20 = vadd.f32 %v317_v14, %v287_v16  ;;  %v344_v21 = vadd.f32 %v317_v14, %v288_v17  ;;  %v345_v45 = vadd.f32 %v317_v14, %v289_v29  ;;  %v346_v56 = vadd.f32 %v317_v14, %v290_v37 }
  0x87   : > { %v378_v30 = vmul.f32 %v343_v20, %v343_v20  ;;  %v608_v31 = vmul.f32 %v2012_v23, %v343_v20  ;;  %v379_v34 = vmul.f32 %v344_v21, %v344_v21  ;;  %v609_v35 = vmul.f32 %v2012_v23, %v344_v21 }
  0x88   : > { %v407_v39 = vmul.f32 %v2010_v22, %v343_v20  ;;  %v408_v40 = vmul.f32 %v2010_v22, %v344_v21  ;;  %v493_v49 = vmul.f32 %v2016_v25, %v343_v20  ;;  %v494_v51 = vmul.f32 %v2016_v25, %v344_v21 }
  0x89   : > { %v579_v41 = vmul.f32 %v2018_v26, %v378_v30  ;;  %v637_v42 = vadd.f32 %v2020_v27, %v608_v31  ;;  %v580_v43 = vmul.f32 %v2018_v26, %v379_v34  ;;  %v638_v44 = vadd.f32 %v2020_v27, %v609_v35 }
  0x8a   : > { %v247_v48 = vpop.permute.xlu0 %246  ;;  %v436_v55 = vadd.f32 %v2014_v24, %v407_v39  ;;  %v437_v58 = vadd.f32 %v2014_v24, %v408_v40  ;;  %v380_v61 = vmul.f32 %v345_v45, %v345_v45  ;;  %v409_v62 = vmul.f32 %v2010_v22, %v345_v45 }
  0x8b   : > { %v242_v46 = vpop.permute.xlu1 %241  ;;  %v665_v57 = vadd.f32 %v637_v42, %v579_v41  ;;  %v666_v59 = vadd.f32 %v638_v44, %v580_v43  ;;  %v283_v60 = vmul.f32 %v1998_v12, %v247_v48  ;;  %v610_v63 = vmul.f32 %v2012_v23, %v345_v45 }
  0x8c   : > { %v284_v0 = vmul.f32 %v2000_v13, %v247_v48  ;;  %v522_v1 = vadd.f32 %v2040_v50, %v493_v49  ;;  %v523_v2 = vadd.f32 %v2040_v50, %v494_v51  ;;  %v285_v3 = vmul.f32 %v2004_v18, %v247_v48 }
  0x8d   : > { %1778 = vrcp.f32 %v665_v57  ;;  %v286_v4 = vmul.f32 %v2006_v19, %v247_v48  ;;  %v464_v5 = vmul.f32 %v436_v55, %v378_v30  ;;  %v465_v6 = vmul.f32 %v437_v58, %v379_v34 }
  0x8e   : > { %1780 = vrcp.f32 %v666_v59  ;;  %v495_v7 = vmul.f32 %v2016_v25, %v345_v45  ;;  %v581_v8 = vmul.f32 %v2018_v26, %v380_v61  ;;  %v639_v10 = vadd.f32 %v2020_v27, %v610_v63 }
  0x8f   : > { %v339_v11 = vadd.f32 %v1990_v9, %v283_v60  ;;  %v279_v14 = vmul.f32 %v1998_v12, %v242_v46  ;;  %v438_v15 = vadd.f32 %v2014_v24, %v409_v62  ;;  %v381_v16 = vmul.f32 %v346_v56, %v346_v56 }
  0x90   : > { %v2066_v17 = vadd.f32 %v1990_v9, %v284_v0  ;;  %v280_v20 = vmul.f32 %v2000_v13, %v242_v46  ;;  %v281_v21 = vmul.f32 %v2004_v18, %v242_v46  ;;  %v282_v28 = vmul.f32 %v2006_v19, %v242_v46 }
  0x91   : > { %v2072_v29 = vadd.f32 %v1990_v9, %v285_v3  ;;  %v2075_v30 = vadd.f32 %v1990_v9, %v286_v4  ;;  %v410_v32 = vmul.f32 %v2010_v22, %v346_v56  ;;  %v611_v33 = vmul.f32 %v2012_v23, %v346_v56 }
  0x92   : > { %v550_v36 = vadd.f32 %v522_v1, %v464_v5  ;;  %v551_v37 = vadd.f32 %v523_v2, %v465_v6  ;;  %v524_v38 = vadd.f32 %v2040_v50, %v495_v7  ;;  %v667_v39 = vadd.f32 %v639_v10, %v581_v8  ;;  %v301_v10 = vpop.permute.xlu2 %300 }
  0x93   : > { %v232_v31 = vpop.permute.xlu1 %231  ;;  %v1779_v34 = vpop.eup %1778  ;;  %v466_v41 = vmul.f32 %v438_v15, %v380_v61  ;;  %v496_v42 = vmul.f32 %v2016_v25, %v346_v56  ;;  %v582_v9 = vmul.f32 %v2018_v26, %v381_v16  ;;  %v374_v43 = vmul.f32 %v339_v11, %v339_v11 }
  0x94   : > { %v309_v35 = vpop.permute.xlu0 %308  ;;  %v1781_v40 = vpop.eup %1780  ;;  %v721_v44 = vmul.f32 %v1779_v34, %v665_v57  ;;  %1782 = vrcp.f32 %v667_v39  ;;  %v403_v46 = vmul.f32 %v2010_v22, %v339_v11  ;;  %v439_v51 = vadd.f32 %v2014_v24, %v410_v32 }
  0x95   : > { %v722_v45 = vmul.f32 %v1781_v40, %v666_v59  ;;  %v2083_v48 = vadd.f32 %v309_v35, %v279_v14  ;;  %v2085_v49 = vadd.f32 %v309_v35, %v280_v20  ;;  %v640_v55 = vadd.f32 %v2020_v27, %v611_v33 }
  0x96   : > { %v2089_v58 = vadd.f32 %v309_v35, %v281_v21  ;;  %v271_v56 = vmul.f32 %v1998_v12, %v232_v31  ;;  %v749_v60 = vsub.f32 2.0, %v721_v44  ;;  %v272_v57 = vmul.f32 %v2000_v13, %v232_v31 }
  0x97   : > { %v750_v61 = vsub.f32 2.0, %v722_v45  ;;  %v273_v59 = vmul.f32 %v2004_v18, %v232_v31  ;;  %v274_v62 = vmul.f32 %v2006_v19, %v232_v31  ;;  %v668_v63 = vadd.f32 %v640_v55, %v582_v9 }
  0x98   : > { %v2095_v0 = vadd.f32 %v309_v35, %v282_v28  ;;  %v552_v1 = vadd.f32 %v524_v38, %v466_v41  ;;  %v525_v2 = vadd.f32 %v2040_v50, %v496_v42  ;;  %v604_v3 = vmul.f32 %v2012_v23, %v339_v11 }
  0x99   : > { %v467_v4 = vmul.f32 %v439_v51, %v381_v16  ;;  %v432_v5 = vadd.f32 %v2014_v24, %v403_v46  ;;  %v489_v6 = vmul.f32 %v2016_v25, %v339_v11  ;;  %v575_v7 = vmul.f32 %v2018_v26, %v374_v43 }
  0x9a   : > { %v1783_v8 = vpop.eup %1782  ;;  %v777_v14 = vmul.f32 %v1779_v34, %v749_v60  ;;  %v778_v15 = vmul.f32 %v1781_v40, %v750_v61  ;;  %1784 = vrcp.f32 %v668_v63  ;;  %v375_v20 = vmul.f32 %v2066_v17, %v2066_v17 }
  0x9b   : > { %v2104_v21 = vadd.f32 %v301_v10, %v271_v56  ;;  %v2106_v28 = vadd.f32 %v301_v10, %v272_v57  ;;  %v2108_v31 = vadd.f32 %v301_v10, %v273_v59  ;;  %v2110_v16 = vadd.f32 %v301_v10, %v274_v62  ;;  %v227_v32 = vpop.permute.xlu1 %226 }
  0x9c   : > { %v805_v11 = vmul.f32 %v777_v14, %v550_v36  ;;  %v806_v33 = vmul.f32 %v778_v15, %v551_v37  ;;  %v723_v35 = vmul.f32 %v1783_v8, %v667_v39  ;;  %v633_v38 = vadd.f32 %v2020_v27, %v604_v3  ;;  %v222_v44 = vpop.permute.xlu0 %221 }
  0x9d   : > { %v553_v34 = vadd.f32 %v525_v2, %v467_v4  ;;  %v460_v40 = vmul.f32 %v432_v5, %v374_v43  ;;  %v518_v41 = vadd.f32 %v2040_v50, %v489_v6  ;;  %v605_v42 = vmul.f32 %v2012_v23, %v2066_v17 }
  0x9e   : > { %v2117_v9 = vmul.f32 %v1998_v12, %v227_v32  ;;  %1699 = vmatpush.msk.msra.mxu0 %vm866_vm0, %v805_v11  ;;  %1707 = vmatpush.msk.msra.mxu1 %vm866_vm0, %v806_v33  ;;  %v751_v36 = vsub.f32 2.0, %v723_v35  ;;  %v661_v37 = vadd.f32 %v633_v38, %v575_v7  ;;  %v576_v39 = vmul.f32 %v2018_v26, %v375_v20 }
  0x9f   : > { %v2123_v45 = vmul.f32 %v2000_v13, %v227_v32  ;;  %v2126_v43 = vmul.f32 %v2004_v18, %v227_v32  ;;  %v634_v46 = vadd.f32 %v2020_v27, %v605_v42  ;;  %v376_v51 = vmul.f32 %v2072_v29, %v2072_v29 }
  0xa0   : > { %v1785_v55 = vpop.eup %1784  ;;  %v779_v56 = vmul.f32 %v1783_v8, %v751_v36  ;;  %1786 = vrcp.f32 %v661_v37  ;;  %v404_v60 = vmul.f32 %v2010_v22, %v2066_v17  ;;  %v405_v61 = vmul.f32 %v2010_v22, %v2072_v29 }
  0xa1   : > { %v2136_v57 = vmul.f32 %v2006_v19, %v227_v32  ;;  %v2139_v59 = vmul.f32 %v1998_v12, %v222_v44  ;;  %v2142_v62 = vmul.f32 %v2000_v13, %v222_v44  ;;  %v724_v2 = vmul.f32 %v1785_v55, %v668_v63 }
  0xa2   : > { %v2145_v3 = vmul.f32 %v2004_v18, %v222_v44  ;;  %v2148_v4 = vmul.f32 %v2006_v19, %v222_v44  ;;  %v807_v5 = vmul.f32 %v779_v56, %v552_v1  ;;  %v662_v6 = vadd.f32 %v634_v46, %v576_v39 }
  0xa3   : > { %v752_v7 = vsub.f32 2.0, %v724_v2  ;;  %v490_v8 = vmul.f32 %v2016_v25, %v2066_v17  ;;  %v577_v10 = vmul.f32 %v2018_v26, %v376_v51  ;;  %v606_v12 = vmul.f32 %v2012_v23, %v2072_v29 }
  0xa4   : > { %1715 = vmatpush.msk.msra.mxu2 %vm866_vm0, %v807_v5  ;;  %v433_v13 = vadd.f32 %v2014_v24, %v404_v60  ;;  %1788 = vrcp.f32 %v662_v6  ;;  %v434_v18 = vadd.f32 %v2014_v24, %v405_v61  ;;  %v377_v19 = vmul.f32 %v2075_v30, %v2075_v30 }
  0xa5   : > { %v780_v63 = vmul.f32 %v1785_v55, %v752_v7  ;;  %v546_v1 = vadd.f32 %v518_v41, %v460_v40  ;;  %v491_v17 = vmul.f32 %v2016_v25, %v2072_v29  ;;  %v635_v14 = vadd.f32 %v2020_v27, %v606_v12 }
  0xa6   : > { %v1787_v15 = vpop.eup %1786  ;;  %v406_v32 = vmul.f32 %v2010_v22, %v2075_v30  ;;  %v578_v11 = vmul.f32 %v2018_v26, %v377_v19  ;;  %v607_v33 = vmul.f32 %v2012_v23, %v2075_v30  ;;  %v370_v35 = vmul.f32 %v2083_v48, %v2083_v48 }
  0xa7   : > { %v808_v38 = vmul.f32 %v780_v63, %v553_v34  ;;  %v717_v42 = vmul.f32 %v1787_v15, %v661_v37  ;;  %v519_v40 = vadd.f32 %v2040_v50, %v490_v8  ;;  %v663_v41 = vadd.f32 %v635_v14, %v577_v10 }
  0xa8   : > { %v461_v29 = vmul.f32 %v433_v13, %v375_v20  ;;  %v462_v44 = vmul.f32 %v434_v18, %v376_v51  ;;  %v636_v36 = vadd.f32 %v2020_v27, %v607_v33  ;;  %v399_v39 = vmul.f32 %v2010_v22, %v2083_v48 }
  0xa9   : > { %1723 = vmatpush.msk.msra.mxu3 %vm866_vm0, %v808_v38  ;;  %v745_v46 = vsub.f32 2.0, %v717_v42  ;;  %1790 = vrcp.f32 %v663_v41  ;;  %v571_v55 = vmul.f32 %v2018_v26, %v370_v35  ;;  %v600_v34 = vmul.f32 %v2012_v23, %v2083_v48 }
  0xaa   : > { %v1789_v37 = vpop.eup %1788  ;;  %v520_v56 = vadd.f32 %v2040_v50, %v491_v17  ;;  %v435_v20 = vadd.f32 %v2014_v24, %v406_v32  ;;  %v492_v51 = vmul.f32 %v2016_v25, %v2075_v30  ;;  %v664_v60 = vadd.f32 %v636_v36, %v578_v11 }
  0xab   : > { %v773_v61 = vmul.f32 %v1787_v15, %v745_v46  ;;  %v718_v2 = vmul.f32 %v1789_v37, %v662_v6  ;;  %v629_v5 = vadd.f32 %v2020_v27, %v600_v34  ;;  %v371_v7 = vmul.f32 %v2085_v49, %v2085_v49 }
  0xac   : > { %v547_v8 = vadd.f32 %v519_v40, %v461_v29  ;;  %v548_v10 = vadd.f32 %v520_v56, %v462_v44  ;;  %1792 = vrcp.f32 %v664_v60  ;;  %v428_v12 = vadd.f32 %v2014_v24, %v399_v39 }
  0xad   : > { %v801_v13 = vmul.f32 %v773_v61, %v546_v1  ;;  %v746_v18 = vsub.f32 2.0, %v718_v2  ;;  %v657_v63 = vadd.f32 %v629_v5, %v571_v55  ;;  %v400_v17 = vmul.f32 %v2010_v22, %v2085_v49 }
  0xae   : > { %v463_v30 = vmul.f32 %v435_v20, %v377_v19  ;;  %v485_v6 = vmul.f32 %v2016_v25, %v2083_v48  ;;  %v572_v14 = vmul.f32 %v2018_v26, %v371_v7  ;;  %v601_v15 = vmul.f32 %v2012_v23, %v2085_v49 }
  0xaf   : > { %v1791_v32 = vpop.eup %1790  ;;  %889 = vmatpush.msra.mxu0 %v801_v13  ;;  %v774_v11 = vmul.f32 %v1789_v37, %v746_v18  ;;  %v521_v33 = vadd.f32 %v2040_v50, %v492_v51  ;;  %1794 = vrcp.f32 %v657_v63  ;;  %v372_v1 = vmul.f32 %v2089_v58, %v2089_v58 }
  0xb0   : > { %v719_v38 = vmul.f32 %v1791_v32, %v663_v41  ;;  %v456_v42 = vmul.f32 %v428_v12, %v370_v35  ;;  %v630_v19 = vadd.f32 %v2020_v27, %v601_v15  ;;  %v401_v48 = vmul.f32 %v2010_v22, %v2089_v58 }
  0xb1   : > { %v802_v40 = vmul.f32 %v774_v11, %v547_v8  ;;  %v429_v29 = vadd.f32 %v2014_v24, %v400_v17  ;;  %v573_v44 = vmul.f32 %v2018_v26, %v372_v1  ;;  %v602_v36 = vmul.f32 %v2012_v23, %v2089_v58 }
  0xb2   : > { %v1793_v39 = vpop.eup %1792  ;;  %v747_v46 = vsub.f32 2.0, %v719_v38  ;;  %v549_v55 = vadd.f32 %v521_v33, %v463_v30  ;;  %v514_v34 = vadd.f32 %v2040_v50, %v485_v6  ;;  %v658_v41 = vadd.f32 %v630_v19, %v572_v14 }
  0xb3   : > { %927 = vmatpush.msra.mxu1 %v802_v40  ;;  %v720_v35 = vmul.f32 %v1793_v39, %v664_v60  ;;  %v486_v37 = vmul.f32 %v2016_v25, %v2085_v49  ;;  %v631_v56 = vadd.f32 %v2020_v27, %v602_v36  ;;  %v373_v20 = vmul.f32 %v2095_v0, %v2095_v0 }
  0xb4   : > { %v775_v51 = vmul.f32 %v1791_v32, %v747_v46  ;;  %v542_v61 = vadd.f32 %v514_v34, %v456_v42  ;;  %1796 = vrcp.f32 %v658_v41  ;;  %v430_v2 = vadd.f32 %v2014_v24, %v401_v48 }
  0xb5   : > { %v1795_v5 = vpop.eup %1794  ;;  %v748_v8 = vsub.f32 2.0, %v720_v35  ;;  %v457_v12 = vmul.f32 %v429_v29, %v371_v7  ;;  %v487_v13 = vmul.f32 %v2016_v25, %v2089_v58  ;;  %v659_v60 = vadd.f32 %v631_v56, %v573_v44 }
  0xb6   : > { %v803_v18 = vmul.f32 %v775_v51, %v548_v10  ;;  %v713_v17 = vmul.f32 %v1795_v5, %v657_v63  ;;  %v402_v49 = vmul.f32 %v2010_v22, %v2095_v0  ;;  %v574_v30 = vmul.f32 %v2018_v26, %v373_v20 }
  0xb7   : > { %v776_v6 = vmul.f32 %v1793_v39, %v748_v8  ;;  %1798 = vrcp.f32 %v659_v60  ;;  %v603_v14 = vmul.f32 %v2012_v23, %v2095_v0  ;;  %v366_v15 = vmul.f32 %v2036_v47, %v2036_v47 }
  0xb8   : > { %965 = vmatpush.msra.mxu2 %v803_v18  ;;  %v741_v7 = vsub.f32 2.0, %v713_v17  ;;  %v515_v58 = vadd.f32 %v2040_v50, %v486_v37  ;;  %v458_v32 = vmul.f32 %v430_v2, %v372_v1  ;;  %v395_v10 = vmul.f32 %v2010_v22, %v2036_v47 }
  0xb9   : > { %v804_v63 = vmul.f32 %v776_v6, %v549_v55  ;;  %v632_v11 = vadd.f32 %v2020_v27, %v603_v14  ;;  %v567_v33 = vmul.f32 %v2018_v26, %v366_v15  ;;  %v596_v38 = vmul.f32 %v2012_v23, %v2036_v47  ;;  %v2250_v14 = vpop.permute.xlu2 %292 }
  0xba   : > { %v1797_v42 = vpop.eup %1796  ;;  %v769_v19 = vmul.f32 %v1795_v5, %v741_v7  ;;  %v543_v48 = vadd.f32 %v515_v58, %v457_v12  ;;  %v516_v40 = vadd.f32 %v2040_v50, %v487_v13  ;;  %v431_v29 = vadd.f32 %v2014_v24, %v402_v49 }
  0xbb   : > { %1003 = vmatpush.msra.mxu3 %v804_v63  ;;  %v714_v1 = vmul.f32 %v1797_v42, %v658_v41  ;;  %v660_v44 = vadd.f32 %v632_v11, %v574_v30  ;;  %v625_v36 = vadd.f32 %v2020_v27, %v596_v38  ;;  %v367_v39 = vmul.f32 %v2043_v52, %v2043_v52 }
  0xbc   : > { %v797_v46 = vmul.f32 %v769_v19, %v542_v61  ;;  %v488_v55 = vmul.f32 %v2016_v25, %v2095_v0  ;;  %v424_v34 = vadd.f32 %v2014_v24, %v395_v10  ;;  %v481_v35 = vmul.f32 %v2016_v25, %v2036_v47 }
  0xbd   : > { %v1799_v37 = vpop.eup %1798  ;;  %v742_v56 = vsub.f32 2.0, %v714_v1  ;;  %v544_v51 = vadd.f32 %v516_v40, %v458_v32  ;;  %1800 = vrcp.f32 %v660_v44  ;;  %v653_v41 = vadd.f32 %v625_v36, %v567_v33 }
  0xbe   : > { %890 = vmatpush.msra.mxu0 %v797_v46  ;;  %v715_v2 = vmul.f32 %v1799_v37, %v659_v60  ;;  %v459_v5 = vmul.f32 %v431_v29, %v373_v20  ;;  %v396_v8 = vmul.f32 %v2010_v22, %v2043_v52  ;;  %v568_v61 = vmul.f32 %v2018_v26, %v367_v39 }
  0xbf   : > { %v770_v12 = vmul.f32 %v1797_v42, %v742_v56  ;;  %1802 = vrcp.f32 %v653_v41  ;;  %v597_v0 = vmul.f32 %v2012_v23, %v2043_v52  ;;  %v368_v47 = vmul.f32 %v2045_v53, %v2045_v53 }
  0xc0   : > { %v743_v13 = vsub.f32 2.0, %v715_v2  ;;  %v452_v18 = vmul.f32 %v424_v34, %v366_v15  ;;  %v510_v17 = vadd.f32 %v2040_v50, %v481_v35  ;;  %v397_v20 = vmul.f32 %v2010_v22, %v2045_v53 }
  0xc1   : > { %v798_v60 = vmul.f32 %v770_v12, %v543_v48  ;;  %v626_v49 = vadd.f32 %v2020_v27, %v597_v0  ;;  %v569_v30 = vmul.f32 %v2018_v26, %v368_v47  ;;  %v598_v6 = vmul.f32 %v2012_v23, %v2045_v53 }
  0xc2   : > { %v771_v7 = vmul.f32 %v1799_v37, %v743_v13  ;;  %v517_v58 = vadd.f32 %v2040_v50, %v488_v55  ;;  %v425_v15 = vadd.f32 %v2014_v24, %v396_v8  ;;  %v482_v32 = vmul.f32 %v2016_v25, %v2043_v52 }
  0xc3   : > { %v1801_v10 = vpop.eup %1800  ;;  %v2258_v63 = vadd.f32 %v2250_v14, %v2139_v59  ;;  %928 = vmatpush.msra.mxu1 %v798_v60  ;;  %v654_v11 = vadd.f32 %v626_v49, %v568_v61  ;;  %v627_v33 = vadd.f32 %v2020_v27, %v598_v6  ;;  %v369_v38 = vmul.f32 %v2047_v54, %v2047_v54 }
  0xc4   : > { %v799_v42 = vmul.f32 %v771_v7, %v544_v51  ;;  %v545_v19 = vadd.f32 %v517_v58, %v459_v5  ;;  %v716_v48 = vmul.f32 %v1801_v10, %v660_v44  ;;  %v483_v40 = vmul.f32 %v2016_v25, %v2045_v53 }
  0xc5   : > { %v1803_v29 = vpop.eup %1802  ;;  %v538_v52 = vadd.f32 %v510_v17, %v452_v18  ;;  %1804 = vrcp.f32 %v654_v11  ;;  %v426_v1 = vadd.f32 %v2014_v24, %v397_v20  ;;  %v655_v59 = vadd.f32 %v627_v33, %v569_v30 }
  0xc6   : > { %966 = vmatpush.msra.mxu2 %v799_v42  ;;  %v744_v36 = vsub.f32 2.0, %v716_v48  ;;  %v709_v46 = vmul.f32 %v1803_v29, %v653_v41  ;;  %v453_v55 = vmul.f32 %v425_v15, %v367_v39  ;;  %v511_v34 = vadd.f32 %v2040_v50, %v482_v32  ;;  %v2275_v41 = vpop.permute.xlu1 %296 }
  0xc7   : > { %1806 = vrcp.f32 %v655_v59  ;;  %v570_v35 = vmul.f32 %v2018_v26, %v369_v38  ;;  %v599_v44 = vmul.f32 %v2012_v23, %v2047_v54  ;;  %v362_v53 = vmul.f32 %v2104_v21, %v2104_v21 }
  0xc8   : > { %v772_v37 = vmul.f32 %v1801_v10, %v744_v36  ;;  %v737_v56 = vsub.f32 2.0, %v709_v46  ;;  %v512_v51 = vadd.f32 %v2040_v50, %v483_v40  ;;  %v398_v2 = vmul.f32 %v2010_v22, %v2047_v54 }
  0xc9   : > { %v454_v39 = vmul.f32 %v426_v1, %v368_v47  ;;  %v628_v5 = vadd.f32 %v2020_v27, %v599_v44  ;;  %v563_v8 = vmul.f32 %v2018_v26, %v362_v53  ;;  %v592_v61 = vmul.f32 %v2012_v23, %v2104_v21 }
  0xca   : > { %v800_v12 = vmul.f32 %v772_v37, %v545_v19  ;;  %v765_v0 = vmul.f32 %v1803_v29, %v737_v56  ;;  %v484_v13 = vmul.f32 %v2016_v25, %v2047_v54  ;;  %v391_v18 = vmul.f32 %v2010_v22, %v2104_v21 }
  0xcb   : > { %v1805_v17 = vpop.eup %1804  ;;  %v2287_v20 = vadd.f32 %v2250_v14, %v2142_v62  ;;  %v656_v47 = vadd.f32 %v628_v5, %v570_v35  ;;  %v621_v60 = vadd.f32 %v2020_v27, %v592_v61  ;;  %v363_v49 = vmul.f32 %v2106_v28, %v2106_v28 }
  0xcc   : > { %v2294_v30 = vadd.f32 %v2275_v41, %v2117_v9  ;;  %1004 = vmatpush.msra.mxu3 %v800_v12  ;;  %v793_v54 = vmul.f32 %v765_v0, %v538_v52  ;;  %v539_v6 = vadd.f32 %v511_v34, %v453_v55  ;;  %v710_v7 = vmul.f32 %v1805_v17, %v654_v11 }
  0xcd   : > { %v1807_v58 = vpop.eup %1806  ;;  %v540_v15 = vadd.f32 %v512_v51, %v454_v39  ;;  %v427_v32 = vadd.f32 %v2014_v24, %v398_v2  ;;  %1808 = vrcp.f32 %v656_v47  ;;  %v649_v62 = vadd.f32 %v621_v60, %v563_v8 }
  0xce   : > { %891 = vmatpush.msra.mxu0 %v793_v54  ;;  %v738_v10 = vsub.f32 2.0, %v710_v7  ;;  %v711_v33 = vmul.f32 %v1807_v58, %v655_v59  ;;  %v513_v42 = vadd.f32 %v2040_v50, %v484_v13  ;;  %v420_v19 = vadd.f32 %v2014_v24, %v391_v18 }
  0xcf   : > { %1810 = vrcp.f32 %v649_v62  ;;  %v564_v9 = vmul.f32 %v2018_v26, %v363_v49  ;;  %v593_v48 = vmul.f32 %v2012_v23, %v2106_v28  ;;  %v364_v11 = vmul.f32 %v2108_v31, %v2108_v31 }
  0xd0   : > { %v766_v40 = vmul.f32 %v1805_v17, %v738_v10  ;;  %v739_v29 = vsub.f32 2.0, %v711_v33  ;;  %v477_v52 = vmul.f32 %v2016_v25, %v2104_v21  ;;  %v392_v1 = vmul.f32 %v2010_v22, %v2106_v28 }
  0xd1   : > { %v455_v59 = vmul.f32 %v427_v32, %v369_v38  ;;  %v622_v36 = vadd.f32 %v2020_v27, %v593_v48  ;;  %v565_v46 = vmul.f32 %v2018_v26, %v364_v11  ;;  %v594_v55 = vmul.f32 %v2012_v23, %v2108_v31 }
  0xd2   : > { %v2314_v34 = vadd.f32 %v2275_v41, %v2123_v45  ;;  %v794_v35 = vmul.f32 %v766_v40, %v539_v6  ;;  %v767_v44 = vmul.f32 %v1807_v58, %v739_v29  ;;  %v448_v37 = vmul.f32 %v420_v19, %v362_v53 }
  0xd3   : > { %v1809_v56 = vpop.eup %1808  ;;  %v2318_v21 = vadd.f32 %v2275_v41, %v2126_v43  ;;  %v650_v38 = vadd.f32 %v622_v36, %v564_v9  ;;  %v623_v51 = vadd.f32 %v2020_v27, %v594_v55  ;;  %v2323_v2 = vmul.f32 %v2110_v16, %v2110_v16 }
  0xd4   : > { %929 = vmatpush.msra.mxu1 %v794_v35  ;;  %v795_v39 = vmul.f32 %v767_v44, %v540_v15  ;;  %v712_v5 = vmul.f32 %v1809_v56, %v656_v47  ;;  %v506_v45 = vadd.f32 %v2040_v50, %v477_v52  ;;  %v421_v8 = vadd.f32 %v2014_v24, %v392_v1 }
  0xd5   : > { %v1811_v53 = vpop.eup %1810  ;;  %v541_v61 = vadd.f32 %v513_v42, %v455_v59  ;;  %1812 = vrcp.f32 %v650_v38  ;;  %v393_v43 = vmul.f32 %v2010_v22, %v2108_v31  ;;  %v651_v12 = vadd.f32 %v623_v51, %v565_v46 }
  0xd6   : > { %967 = vmatpush.msra.mxu2 %v795_v39  ;;  %v740_v0 = vsub.f32 2.0, %v712_v5  ;;  %v534_v13 = vadd.f32 %v506_v45, %v448_v37  ;;  %v705_v18 = vmul.f32 %v1811_v53, %v649_v62  ;;  %v478_v17 = vmul.f32 %v2016_v25, %v2106_v28 }
  0xd7   : > { %1814 = vrcp.f32 %v651_v12  ;;  %v566_v47 = vmul.f32 %v2018_v26, %v2323_v2  ;;  %v595_v60 = vmul.f32 %v2012_v23, %v2110_v16  ;;  %v358_v54 = vmul.f32 %v2294_v30, %v2294_v30 }
  0xd8   : > { %v768_v6 = vmul.f32 %v1809_v56, %v740_v0  ;;  %v733_v7 = vsub.f32 2.0, %v705_v18  ;;  %v449_v58 = vmul.f32 %v421_v8, %v363_v49  ;;  %v479_v15 = vmul.f32 %v2016_v25, %v2108_v31 }
  0xd9   : > { %v422_v32 = vadd.f32 %v2014_v24, %v393_v43  ;;  %v624_v28 = vadd.f32 %v2020_v27, %v595_v60  ;;  %v559_v62 = vmul.f32 %v2018_v26, %v358_v54  ;;  %v588_v10 = vmul.f32 %v2012_v23, %v2294_v30 }
  0xda   : > { %v796_v33 = vmul.f32 %v768_v6, %v541_v61  ;;  %v761_v42 = vmul.f32 %v1811_v53, %v733_v7  ;;  %v507_v19 = vadd.f32 %v2040_v50, %v478_v17  ;;  %v394_v9 = vmul.f32 %v2010_v22, %v2110_v16 }
  0xdb   : > { %v1813_v49 = vpop.eup %1812  ;;  %v2349_v31 = vadd.f32 %v2275_v41, %v2136_v57  ;;  %v652_v48 = vadd.f32 %v624_v28, %v566_v47  ;;  %v617_v40 = vadd.f32 %v2020_v27, %v588_v10  ;;  %v359_v29 = vmul.f32 %v2314_v34, %v2314_v34 }
  0xdc   : > { %1005 = vmatpush.msra.mxu3 %v796_v33  ;;  %v789_v52 = vmul.f32 %v761_v42, %v534_v13  ;;  %v535_v1 = vadd.f32 %v507_v19, %v449_v58  ;;  %v706_v59 = vmul.f32 %v1813_v49, %v650_v38  ;;  %v387_v36 = vmul.f32 %v2010_v22, %v2294_v30 }
  0xdd   : > { %v1815_v46 = vpop.eup %1814  ;;  %v450_v55 = vmul.f32 %v422_v32, %v364_v11  ;;  %v508_v35 = vadd.f32 %v2040_v50, %v479_v15  ;;  %1816 = vrcp.f32 %v652_v48  ;;  %v645_v57 = vadd.f32 %v617_v40, %v559_v62 }
  0xde   : > { %892 = vmatpush.msra.mxu0 %v789_v52  ;;  %v734_v41 = vsub.f32 2.0, %v706_v59  ;;  %v707_v44 = vmul.f32 %v1815_v46, %v651_v12  ;;  %v423_v37 = vadd.f32 %v2014_v24, %v394_v9  ;;  %v480_v56 = vmul.f32 %v2016_v25, %v2110_v16 }
  0xdf   : > { %1818 = vrcp.f32 %v645_v57  ;;  %v560_v38 = vmul.f32 %v2018_v26, %v359_v29  ;;  %v589_v51 = vmul.f32 %v2012_v23, %v2314_v34  ;;  %v2365_v11 = vmul.f32 %v2318_v21, %v2318_v21 }
  0xe0   : > { %v762_v39 = vmul.f32 %v1813_v49, %v734_v41  ;;  %v735_v5 = vsub.f32 2.0, %v707_v44  ;;  %v416_v45 = vadd.f32 %v2014_v24, %v387_v36  ;;  %v473_v8 = vmul.f32 %v2016_v25, %v2294_v30 }
  0xe1   : > { %v388_v16 = vmul.f32 %v2010_v22, %v2314_v34  ;;  %v618_v53 = vadd.f32 %v2020_v27, %v589_v51  ;;  %v561_v61 = vmul.f32 %v2018_v26, %v2365_v11  ;;  %v590_v43 = vmul.f32 %v2012_v23, %v2318_v21 }
  0xe2   : > { %v2379_v12 = vadd.f32 %v2250_v14, %v2145_v3  ;;  %v790_v0 = vmul.f32 %v762_v39, %v535_v1  ;;  %v536_v13 = vadd.f32 %v508_v35, %v450_v55  ;;  %v763_v18 = vmul.f32 %v1815_v46, %v735_v5 }
  0xe3   : > { %v1817_v17 = vpop.eup %1816  ;;  %v509_v30 = vadd.f32 %v2040_v50, %v480_v56  ;;  %v646_v47 = vadd.f32 %v618_v53, %v560_v38  ;;  %v619_v60 = vadd.f32 %v2020_v27, %v590_v43  ;;  %v2385_v6 = vmul.f32 %v2349_v31, %v2349_v31 }
  0xe4   : > { %930 = vmatpush.msra.mxu1 %v790_v0  ;;  %v791_v7 = vmul.f32 %v763_v18, %v536_v13  ;;  %v451_v58 = vmul.f32 %v423_v37, %v2323_v2  ;;  %v708_v15 = vmul.f32 %v1817_v17, %v652_v48  ;;  %v444_v3 = vmul.f32 %v416_v45, %v358_v54 }
  0xe5   : > { %v1819_v32 = vpop.eup %1818  ;;  %v502_v28 = vadd.f32 %v2040_v50, %v473_v8  ;;  %v417_v62 = vadd.f32 %v2014_v24, %v388_v16  ;;  %1820 = vrcp.f32 %v646_v47  ;;  %v647_v10 = vadd.f32 %v619_v60, %v561_v61 }
  0xe6   : > { %968 = vmatpush.msra.mxu2 %v791_v7  ;;  %v736_v33 = vsub.f32 2.0, %v708_v15  ;;  %v701_v42 = vmul.f32 %v1819_v32, %v645_v57  ;;  %v474_v19 = vmul.f32 %v2016_v25, %v2314_v34  ;;  %v389_v9 = vmul.f32 %v2010_v22, %v2318_v21 }
  0xe7   : > { %1822 = vrcp.f32 %v647_v10  ;;  %v562_v2 = vmul.f32 %v2018_v26, %v2385_v6  ;;  %v591_v54 = vmul.f32 %v2012_v23, %v2349_v31  ;;  %v354_v49 = vmul.f32 %v2258_v63, %v2258_v63 }
  0xe8   : > { %v537_v48 = vadd.f32 %v509_v30, %v451_v58  ;;  %v764_v40 = vmul.f32 %v1817_v17, %v736_v33  ;;  %v530_v52 = vadd.f32 %v502_v28, %v444_v3  ;;  %v729_v1 = vsub.f32 2.0, %v701_v42 }
  0xe9   : > { %v445_v59 = vmul.f32 %v417_v62, %v359_v29  ;;  %v620_v34 = vadd.f32 %v2020_v27, %v591_v54  ;;  %v555_v36 = vmul.f32 %v2018_v26, %v354_v49  ;;  %v584_v46 = vmul.f32 %v2012_v23, %v2258_v63 }
  0xea   : > { %v792_v55 = vmul.f32 %v764_v40, %v537_v48  ;;  %v757_v35 = vmul.f32 %v1819_v32, %v729_v1  ;;  %v418_v57 = vadd.f32 %v2014_v24, %v389_v9  ;;  %v475_v41 = vmul.f32 %v2016_v25, %v2318_v21 }
  0xeb   : > { %v1821_v44 = vpop.eup %1820  ;;  %v503_v37 = vadd.f32 %v2040_v50, %v474_v19  ;;  %v648_v56 = vadd.f32 %v620_v34, %v562_v2  ;;  %v613_v29 = vadd.f32 %v2020_v27, %v584_v46  ;;  %v2411_v38 = vmul.f32 %v2287_v20, %v2287_v20 }
  0xec   : > { %v2415_v51 = vadd.f32 %v2250_v14, %v2148_v4  ;;  %1006 = vmatpush.msra.mxu3 %v792_v55  ;;  %v785_v39 = vmul.f32 %v757_v35, %v530_v52  ;;  %v702_v5 = vmul.f32 %v1821_v44, %v646_v47  ;;  %v390_v21 = vmul.f32 %v2010_v22, %v2349_v31 }
  0xed   : > { %v1823_v45 = vpop.eup %1822  ;;  %v531_v8 = vadd.f32 %v503_v37, %v445_v59  ;;  %1824 = vrcp.f32 %v648_v56  ;;  %v383_v16 = vmul.f32 %v2010_v22, %v2258_v63  ;;  %v641_v53 = vadd.f32 %v613_v29, %v555_v36 }
  0xee   : > { %893 = vmatpush.msra.mxu0 %v785_v39  ;;  %v730_v61 = vsub.f32 2.0, %v702_v5  ;;  %v446_v43 = vmul.f32 %v418_v57, %v2365_v11  ;;  %v504_v4 = vadd.f32 %v2040_v50, %v475_v41  ;;  %v703_v14 = vmul.f32 %v1823_v45, %v647_v10 }
  0xef   : > { %1826 = vrcp.f32 %v641_v53  ;;  %v556_v0 = vmul.f32 %v2018_v26, %v2411_v38  ;;  %v585_v13 = vmul.f32 %v2012_v23, %v2287_v20  ;;  %v2429_v18 = vmul.f32 %v2379_v12, %v2379_v12 }
  0xf0   : > { %v758_v17 = vmul.f32 %v1821_v44, %v730_v61  ;;  %v731_v30 = vsub.f32 2.0, %v703_v14  ;;  %v419_v47 = vadd.f32 %v2014_v24, %v390_v21  ;;  %v476_v11 = vmul.f32 %v2016_v25, %v2349_v31  ;;  %v809_v61 = vld [vmem:[%s3211_s2] sm:$0xff] }
  0xf1   : > { %v412_v60 = vadd.f32 %v2014_v24, %v383_v16  ;;  %v614_v7 = vadd.f32 %v2020_v27, %v585_v13  ;;  %v557_v58 = vmul.f32 %v2018_v26, %v2429_v18  ;;  %v586_v15 = vmul.f32 %v2012_v23, %v2379_v12 }
  0xf2   : > { %v786_v3 = vmul.f32 %v758_v17, %v531_v8  ;;  %v532_v32 = vadd.f32 %v504_v4, %v446_v43  ;;  %v759_v28 = vmul.f32 %v1823_v45, %v731_v30  ;;  %v469_v62 = vmul.f32 %v2016_v25, %v2258_v63 }
  0xf3   : > { %v1825_v10 = vpop.eup %1824  ;;  %v384_v31 = vmul.f32 %v2010_v22, %v2287_v20  ;;  %v642_v33 = vadd.f32 %v614_v7, %v556_v0  ;;  %v615_v42 = vadd.f32 %v2020_v27, %v586_v15  ;;  %v2447_v19 = vmul.f32 %v2415_v51, %v2415_v51 }
  0xf4   : > { %931 = vmatpush.msra.mxu1 %v786_v3  ;;  %v787_v9 = vmul.f32 %v759_v28, %v532_v32  ;;  %v447_v2 = vmul.f32 %v419_v47, %v2385_v6  ;;  %v704_v54 = vmul.f32 %v1825_v10, %v648_v56  ;;  %v505_v40 = vadd.f32 %v2040_v50, %v476_v11 }
  0xf5   : > { %v1827_v48 = vpop.eup %1826  ;;  %v440_v63 = vmul.f32 %v412_v60, %v354_v49  ;;  %1828 = vrcp.f32 %v642_v33  ;;  %v643_v52 = vadd.f32 %v615_v42, %v557_v58  ;;  %v498_v59 = vadd.f32 %v2040_v50, %v469_v62  ;;  %v1894_v62 = vld [vmem:[%s3210_s1 + $0x20] sm:$0xff]  ;;  %v1895_v42 = vld [vmem:[%s3210_s1 + $0x28] sm:$0xff] }
  0xf6   : > { %969 = vmatpush.msra.mxu2 %v787_v9  ;;  %v732_v1 = vsub.f32 2.0, %v704_v54  ;;  %v697_v34 = vmul.f32 %v1827_v48, %v641_v53  ;;  %v385_v36 = vmul.f32 %v2010_v22, %v2379_v12  ;;  %v413_v46 = vadd.f32 %v2014_v24, %v384_v31  ;;  %v813_v54 = vld [vmem:[%s3211_s2 + $0x20] sm:$0xff] }
  0xf7   : > { %1830 = vrcp.f32 %v643_v52  ;;  %v558_v6 = vmul.f32 %v2018_v26, %v2447_v19  ;;  %v587_v55 = vmul.f32 %v2012_v23, %v2415_v51  ;;  %v533_v49 = vadd.f32 %v505_v40, %v447_v2  ;;  %v2466_v23 = vld [vmem:[%s3210_s1] sm:$0xff]  ;;  %v2472_v26 = vld [vmem:[%s3210_s1 + $0x10] sm:$0xff]  ;;  %v812_v2 = vld [vmem:[%s3211_s2 + $0x18] sm:$0xff] }
  0xf8   : > { %v760_v35 = vmul.f32 %v1825_v10, %v732_v1  ;;  %v725_v57 = vsub.f32 2.0, %v697_v34  ;;  %v526_v41 = vadd.f32 %v498_v59, %v440_v63  ;;  %v470_v44 = vmul.f32 %v2016_v25, %v2287_v20  ;;  %v815_v40 = vld [vmem:[%s3211_s2 + $0x30] sm:$0x3] }
  0xf9   : > { %v616_v37 = vadd.f32 %v2020_v27, %v587_v55  ;;  %v1927_v56 = vmov 2   ;;  %v414_v5 = vadd.f32 %v2014_v24, %v385_v36  ;;  %v441_v20 = vmul.f32 %v413_v46, %v2411_v38  ;;  %v1892_v38 = vld [vmem:[%s3210_s1 + $0x8] sm:$0xff] }
  0xfa   : > { %1772 = vset.pattern.permute.xlu1 %v1927_v56  ;;  %1774 = vset.pattern.permute.xlu0 %v1927_v56  ;;  %v788_v29 = vmul.f32 %v760_v35, %v533_v49  ;;  %v753_v39 = vmul.f32 %v1827_v48, %v725_v57  ;;  %v471_v21 = vmul.f32 %v2016_v25, %v2379_v12  ;;  %v1928_v9 = vmov 3   ;;  %v814_v48 = vld [vmem:[%s3211_s2 + $0x28] sm:$0xff] }
  0xfb   : > { %817 = vperm.xlu1 %1772, %v2466_v23   ;;  %825 = vperm.xlu0 %1774, %v2472_v26   ;;  %v1829_v27 = vpop.eup %1828  ;;  %v644_v45 = vadd.f32 %v616_v37, %v558_v6  ;;  %v386_v53 = vmul.f32 %v2010_v22, %v2415_v51  ;;  %v499_v12 = vadd.f32 %v2040_v50, %v470_v44  ;;  %v2554_v59 = vstv %s1736_s25 }
  0xfc   : > { %1773 = vset.pattern.permute.xlu2 %v1927_v56  ;;  %1007 = vmatpush.msra.mxu3 %v788_v29  ;;  %v781_v8 = vmul.f32 %v753_v39, %v526_v41  ;;  %v698_v16 = vmul.f32 %v1829_v27, %v642_v33  ;;  %v442_v14 = vmul.f32 %v414_v5, %v2429_v18  ;;  %v1893_v18 = vld [vmem:[%s3210_s1 + $0x18] sm:$0xff]  ;;  %v2557_v6 = vstv %s1735_s26 }
  0xfd   : > { %821 = vperm.xlu2 %1773, %v1892_v38   ;;  %v1831_v43 = vpop.eup %1830  ;;  %1832 = vrcp.f32 %v644_v45  ;;  %v527_v22 = vadd.f32 %v499_v12, %v441_v20  ;;  %v500_v17 = vadd.f32 %v2040_v50, %v471_v21  ;;  %v415_v47 = vadd.f32 %v2014_v24, %v386_v53  ;;  %v810_v24 = vld [vmem:[%s3211_s2 + $0x8] sm:$0xff] }
  0xfe   : > { %894 = vmatpush.msra.mxu0 %v781_v8  ;;  %v726_v4 = vsub.f32 2.0, %v698_v16  ;;  %v699_v0 = vmul.f32 %v1831_v43, %v643_v52  ;;  %v472_v58 = vmul.f32 %v2016_v25, %v2415_v51  ;;  %v2559_v55 = vstv %s1737_s27 }
  0xff   : > { %1700 = vmatmul.msk.f32.vlgmr.msra.gmra.mxu0 %vm844_vm1, %v809_v61  ;;  %v528_v60 = vadd.f32 %v500_v17, %v442_v14  ;;  %v443_v32 = vmul.f32 %v415_v47, %v2447_v19  ;;  %v811_v19 = vld [vmem:[%s3211_s2 + $0x10] sm:$0xff]  ;;  %v2561_v49 = vstv %s1731_s28  ;;  %v2568_v56 = vstv %s1732_s29 }
 0x100   : > { %v754_v13 = vmul.f32 %v1829_v27, %v726_v4  ;;  %v727_v30 = vsub.f32 2.0, %v699_v0  ;;  %v501_v25 = vadd.f32 %v2040_v50, %v472_v58  ;;  %v1896_v50 = vld [vmem:[%s3210_s1 + $0x30] sm:$0x3]  ;;  %v2570_v5 = vstv %s1733_s30 }
 0x101   : > { %v2577_v16 = vstv %s1734_s5 }
 0x102   : > { %v782_v11 = vmul.f32 %v754_v13, %v527_v22  ;;  %v755_v7 = vmul.f32 %v1831_v43, %v727_v30  ;;  %v529_v10 = vadd.f32 %v501_v25, %v443_v32  ;;  %3221 = vst [vmem:[#allocation5_spill] sm:$0xff] %v2577_v16 }
 0x103   : > { %829 = vperm.xlu1 %1772, %v1893_v18   ;;  %v1833_v15 = vpop.eup %1832  ;;  %1775 = vset.pattern.permute.xlu0 %v1928_v9 }
 0x104   : > { %932 = vmatpush.msra.mxu1 %v782_v11  ;;  %v783_v3 = vmul.f32 %v755_v7, %v528_v60  ;;  %v700_v28 = vmul.f32 %v1833_v15, %v644_v45  ;;  %1494 = vperm.xlu0 %1775, %v2466_v23  }
 0x105   : > { %833 = vperm.xlu2 %1773, %v1894_v62   ;;  %1708 = vmatmul.msk.f32.vlgmr.msra.gmra.mxu1 %vm844_vm1, %v809_v61 }
 0x106   : > { %970 = vmatpush.msra.mxu2 %v783_v3  ;;  %v728_v51 = vsub.f32 2.0, %v700_v28 }
 0x107   : > { %1716 = vmatmul.msk.f32.vlgmr.msra.gmra.mxu2 %vm844_vm1, %v809_v61  ;;  %1701 = vmatmul.msk.f32.gmra.mxu0 %vm844_vm1, %v810_v24 }
 0x108   : > { %v756_v31 = vmul.f32 %v1833_v15, %v728_v51 }
 0x10a   : > { %v784_v33 = vmul.f32 %v756_v31, %v529_v10 }
 0x10b   : > { %837 = vperm.xlu1 %1772, %v1895_v42  }
 0x10c   : > { %1008 = vmatpush.msra.mxu3 %v784_v33  ;;  %1514 = vperm.xlu0 %1775, %v1895_v42  }
 0x10d   : > { %841 = vperm.xlu2 %1773, %v1896_v50   ;;  %1724 = vmatmul.msk.f32.vlgmr.msra.gmra.mxu3 %vm844_vm1, %v809_v61 }
 0x10e   : > { %1709 = vmatmul.msk.f32.gmra.mxu1 %vm844_vm1, %v810_v24 }
 0x10f   : > { %1717 = vmatmul.msk.f32.gmra.mxu2 %vm844_vm1, %v810_v24  ;;  %1702 = vmatmul.msk.f32.gmra.mxu0 %vm844_vm1, %v811_v19 }
 0x113   : > { %1776 = vset.pattern.permute.xlu1 %v1928_v9 }
 0x114   : > { %1498 = vperm.xlu1 %1776, %v1892_v38  }
 0x115   : > { %1777 = vset.pattern.permute.xlu2 %v1928_v9  ;;  %1725 = vmatmul.msk.f32.gmra.mxu3 %vm844_vm1, %v810_v24 }
 0x116   : > { %1710 = vmatmul.msk.f32.gmra.mxu1 %vm844_vm1, %v811_v19  ;;  %1502 = vperm.xlu2 %1777, %v2472_v26  }
 0x117   : > { %1718 = vmatmul.msk.f32.gmra.mxu2 %vm844_vm1, %v811_v19  ;;  %1703 = vmatmul.msk.f32.gmra.mxu0 %vm844_vm1, %v812_v2 }
 0x11c   : > { %1506 = vperm.xlu1 %1776, %v1893_v18  }
 0x11d   : > { %1726 = vmatmul.msk.f32.gmra.mxu3 %vm844_vm1, %v811_v19 }
 0x11e   : > { %1711 = vmatmul.msk.f32.gmra.mxu1 %vm844_vm1, %v812_v2  ;;  %1510 = vperm.xlu2 %1777, %v1894_v62  }
 0x11f   : > { %1719 = vmatmul.msk.f32.gmra.mxu2 %vm844_vm1, %v812_v2  ;;  %1704 = vmatmul.msk.f32.gmra.mxu0 %vm844_vm1, %v813_v54 }
 0x124   : > { %1518 = vperm.xlu1 %1776, %v1896_v50  }
 0x125   : > { %1727 = vmatmul.msk.f32.gmra.mxu3 %vm844_vm1, %v812_v2 }
 0x126   : > { %1712 = vmatmul.msk.f32.gmra.mxu1 %vm844_vm1, %v813_v54 }
 0x127   : > { %1720 = vmatmul.msk.f32.gmra.mxu2 %vm844_vm1, %v813_v54  ;;  %1705 = vmatmul.msk.f32.gmra.mxu0 %vm844_vm1, %v814_v48 }
 0x12d   : > { %1728 = vmatmul.msk.f32.gmra.mxu3 %vm844_vm1, %v813_v54 }
 0x12e   : > { %1713 = vmatmul.msk.f32.gmra.mxu1 %vm844_vm1, %v814_v48 }
 0x12f   : > { %1721 = vmatmul.msk.f32.gmra.mxu2 %vm844_vm1, %v814_v48  ;;  %1706 = vmatmul.msk.f32.gmra.mxu0 %vm844_vm1, %v815_v40 }
 0x135   : > { %1729 = vmatmul.msk.f32.gmra.mxu3 %vm844_vm1, %v814_v48 }
 0x136   : > { %1714 = vmatmul.msk.f32.gmra.mxu1 %vm844_vm1, %v815_v40 }
 0x137   : > { %1722 = vmatmul.msk.f32.gmra.mxu2 %vm844_vm1, %v815_v40 }
 0x13d   : > { %1730 = vmatmul.msk.f32.gmra.mxu3 %vm844_vm1, %v815_v40 }
 0x157   : > { %v2566_v37 = vpop.permute.xlu2 %821 }
 0x16d   : > { %v818_v63 = vpop.permute.xlu1 %817 }
 0x17c   : > { %v896_v52 = vpop.f32.mrf.mxu0 }
 0x17d   : > { %v897_v1 = vadd.f32 %v896_v52, %v818_v63 }
 0x17f   : > { %v1038_v36 = vmul.f32 %v897_v1, %v897_v1  ;;  %v1268_v46 = vmul.f32 %v2554_v59, %v897_v1  ;;  %v1067_v57 = vmul.f32 %v2561_v49, %v897_v1  ;;  %v1153_v21 = vmul.f32 %v2570_v5, %v897_v1 }
 0x181   : > { %v1239_v41 = vmul.f32 %v2557_v6, %v1038_v36  ;;  %v1297_v44 = vadd.f32 %v2559_v55, %v1268_v46  ;;  %v1096_v20 = vadd.f32 %v2568_v56, %v1067_v57  ;;  %v1182_v0 = vadd.f32 %v2577_v16, %v1153_v21 }
 0x182   : > { %v934_v34 = vpop.f32.mrf.mxu1 }
 0x183   : > { %v935_v35 = vadd.f32 %v934_v34, %v818_v63  ;;  %v1325_v45 = vadd.f32 %v1297_v44, %v1239_v41  ;;  %v1124_v14 = vmul.f32 %v1096_v20, %v1038_v36 }
 0x184   : > { %v899_v39 = vpop.f32.mrf.mxu0 }
 0x185   : > { %v1039_v23 = vmul.f32 %v935_v35, %v935_v35  ;;  %v1068_v26 = vmul.f32 %v2561_v49, %v935_v35  ;;  %v1269_v27 = vmul.f32 %v2554_v59, %v935_v35  ;;  %v900_v8 = vadd.f32 %v899_v39, %v2566_v37 }
 0x186   : > { %v1154_v53 = vmul.f32 %v2570_v5, %v935_v35  ;;  %1834 = vrcp.f32 %v1325_v45  ;;  %v2592_v32 = vadd.f32 %v1182_v0, %v1124_v14 }
 0x187   : > { %v1097_v61 = vadd.f32 %v2568_v56, %v1068_v26  ;;  %v1240_v38 = vmul.f32 %v2557_v6, %v1039_v23  ;;  %v1298_v43 = vadd.f32 %v2559_v55, %v1269_v27  ;;  %v1071_v4 = vmul.f32 %v2561_v49, %v900_v8 }
 0x188   : > { %v1042_v13 = vmul.f32 %v900_v8, %v900_v8  ;;  %v1272_v17 = vmul.f32 %v2554_v59, %v900_v8  ;;  %v1157_v11 = vmul.f32 %v2570_v5, %v900_v8  ;;  %v1183_v7 = vadd.f32 %v2577_v16, %v1154_v53 }
 0x189   : > { %v1125_v60 = vmul.f32 %v1097_v61, %v1039_v23  ;;  %v2588_v58 = vadd.f32 %v1298_v43, %v1240_v38  ;;  %v1100_v18 = vadd.f32 %v2568_v56, %v1071_v4 }
 0x18a   : > { %v972_v29 = vpop.f32.mrf.mxu2  ;;  %v1243_v62 = vmul.f32 %v2557_v6, %v1042_v13  ;;  %v1301_v25 = vadd.f32 %v2559_v55, %v1272_v17  ;;  %v1186_v33 = vadd.f32 %v2577_v16, %v1157_v11 }
 0x18b   : > { %v973_v22 = vadd.f32 %v972_v29, %v818_v63  ;;  %v937_v30 = vpop.f32.mrf.mxu1  ;;  %1836 = vrcp.f32 %v2588_v58  ;;  %v1128_v19 = vmul.f32 %v1100_v18, %v1042_v13  ;;  %v2604_v9 = vadd.f32 %v1183_v7, %v1125_v60 }
 0x18c   : > { %v938_v15 = vadd.f32 %v937_v30, %v2566_v37  ;;  %v2600_v42 = vpop.eup %1834  ;;  %v902_v52 = vpop.f32.mrf.mxu0  ;;  %v2613_v36 = vadd.f32 %v1301_v25, %v1243_v62 }
 0x18d   : > { %v1040_v28 = vmul.f32 %v973_v22, %v973_v22  ;;  %v1270_v24 = vmul.f32 %v2554_v59, %v973_v22  ;;  %v1069_v51 = vmul.f32 %v2561_v49, %v973_v22  ;;  %v1155_v2 = vmul.f32 %v2570_v5, %v973_v22 }
 0x18e   : > { %v1043_v54 = vmul.f32 %v938_v15, %v938_v15  ;;  %v1072_v48 = vmul.f32 %v2561_v49, %v938_v15  ;;  %v1273_v40 = vmul.f32 %v2554_v59, %v938_v15  ;;  %v1158_v46 = vmul.f32 %v2570_v5, %v938_v15 }
 0x18f   : > { %v1241_v1 = vmul.f32 %v2557_v6, %v1040_v28  ;;  %v1299_v34 = vadd.f32 %v2559_v55, %v1270_v24  ;;  %v1098_v35 = vadd.f32 %v2568_v56, %v1069_v51  ;;  %v2620_v29 = vmul.f32 %v2600_v42, %v1325_v45 }
 0x190   : > { %v1010_v12 = vpop.f32.mrf.mxu3  ;;  %v2626_v20 = vadd.f32 %v2577_v16, %v1155_v2  ;;  %v1101_v21 = vadd.f32 %v2568_v56, %v1072_v48  ;;  %v1244_v8 = vmul.f32 %v2557_v6, %v1043_v54  ;;  %v1302_v53 = vadd.f32 %v2559_v55, %v1273_v40 }
 0x191   : > { %v1011_v47 = vadd.f32 %v1010_v12, %v818_v63  ;;  %v2609_v63 = vpop.permute.xlu0 %825  ;;  %v2631_v61 = vpop.eup %1836  ;;  %v1327_v45 = vadd.f32 %v1299_v34, %v1241_v1  ;;  %1838 = vrcp.f32 %v2613_v36  ;;  %v2635_v38 = vadd.f32 %v2577_v16, %v1158_v46 }
 0x192   : > { %v975_v3 = vpop.f32.mrf.mxu2  ;;  %v903_v27 = vadd.f32 %v902_v52, %v2609_v63  ;;  %v2638_v12 = vmul.f32 %v1098_v35, %v1040_v28  ;;  %v2646_v60 = vmul.f32 %v1101_v21, %v1043_v54  ;;  %v2648_v7 = vadd.f32 %v1302_v53, %v1244_v8 }
 0x193   : > { %v1041_v10 = vmul.f32 %v1011_v47, %v1011_v47  ;;  %v1271_v31 = vmul.f32 %v2554_v59, %v1011_v47  ;;  %v976_v50 = vadd.f32 %v975_v3, %v2566_v37  ;;  %v1070_v39 = vmul.f32 %v2561_v49, %v1011_v47  ;;  %v940_v22 = vpop.f32.mrf.mxu1 }
 0x194   : > { %v1075_v43 = vmul.f32 %v2561_v49, %v903_v27  ;;  %v1156_v4 = vmul.f32 %v2570_v5, %v1011_v47  ;;  %v1409_v47 = vsub.f32 2.0, %v2620_v29  ;;  %1840 = vrcp.f32 %v1327_v45 }
 0x195   : > { %v1242_v57 = vmul.f32 %v2557_v6, %v1041_v10  ;;  %v1300_v41 = vadd.f32 %v2559_v55, %v1271_v31  ;;  %v1044_v23 = vmul.f32 %v976_v50, %v976_v50  ;;  %v1274_v26 = vmul.f32 %v2554_v59, %v976_v50 }
 0x196   : > { %v1073_v0 = vmul.f32 %v2561_v49, %v976_v50  ;;  %v1099_v13 = vadd.f32 %v2568_v56, %v1070_v39  ;;  %v1159_v18 = vmul.f32 %v2570_v5, %v976_v50  ;;  %v1104_v15 = vadd.f32 %v2568_v56, %v1075_v43 }
 0x197   : > { %v1328_v14 = vadd.f32 %v1300_v41, %v1242_v57  ;;  %v1245_v17 = vmul.f32 %v2557_v6, %v1044_v23  ;;  %v1303_v30 = vadd.f32 %v2559_v55, %v1274_v26  ;;  %v941_v3 = vadd.f32 %v940_v22, %v2609_v63  ;;  %v2660_v25 = vpop.eup %1838 }
 0x198   : > { %v1013_v44 = vpop.f32.mrf.mxu3  ;;  %v2654_v28 = vadd.f32 %v1186_v33, %v1128_v19  ;;  %v2657_v24 = vadd.f32 %v2577_v16, %v1156_v4  ;;  %v1046_v62 = vmul.f32 %v903_v27, %v903_v27  ;;  %v2662_v51 = vmul.f32 %v1099_v13, %v1041_v10 }
 0x199   : > { %v1014_v11 = vadd.f32 %v1013_v44, %v2566_v37  ;;  %1842 = vrcp.f32 %v1328_v14  ;;  %v1102_v37 = vadd.f32 %v2568_v56, %v1073_v0  ;;  %v2664_v31 = vadd.f32 %v1303_v30, %v1245_v17 }
 0x19a   : > { %v1161_v2 = vmul.f32 %v2570_v5, %v903_v27  ;;  %v978_v54 = vpop.f32.mrf.mxu2  ;;  %1844 = vrcp.f32 %v2648_v7  ;;  %v2670_v33 = vadd.f32 %v2577_v16, %v1159_v18  ;;  %v2673_v52 = vmul.f32 %v1104_v15, %v1046_v62  ;;  %v1841_v44 = vpop.eup %1840 }
 0x19b   : > { %v1074_v50 = vmul.f32 %v2561_v49, %v1014_v11  ;;  %v1045_v19 = vmul.f32 %v1014_v11, %v1014_v11  ;;  %v1275_v48 = vmul.f32 %v2554_v59, %v1014_v11  ;;  %v1276_v10 = vmul.f32 %v2554_v59, %v903_v27 }
 0x19c   : > { %v1047_v1 = vmul.f32 %v941_v3, %v941_v3  ;;  %v1277_v34 = vmul.f32 %v2554_v59, %v941_v3  ;;  %v2677_v46 = vmul.f32 %v1102_v37, %v1044_v23  ;;  %v1160_v35 = vmul.f32 %v2570_v5, %v1014_v11 }
 0x19d   : > { %v1247_v57 = vmul.f32 %v2557_v6, %v1046_v62  ;;  %v979_v41 = vadd.f32 %v978_v54, %v2609_v63  ;;  %1846 = vrcp.f32 %v2664_v31  ;;  %v1103_v39 = vadd.f32 %v2568_v56, %v1074_v50 }
 0x19e   : > { %v2685_v26 = vadd.f32 %v2577_v16, %v1161_v2  ;;  %v1246_v23 = vmul.f32 %v2557_v6, %v1045_v19  ;;  %v1304_v8 = vadd.f32 %v2559_v55, %v1275_v48  ;;  %v1076_v53 = vmul.f32 %v2561_v49, %v941_v3 }
 0x19f   : > { %v1843_v21 = vpop.eup %1842  ;;  %v1382_v43 = vmul.f32 %v2631_v61, %v2588_v58  ;;  %v1305_v4 = vadd.f32 %v2559_v55, %v1276_v10  ;;  %v1162_v0 = vmul.f32 %v2570_v5, %v941_v3  ;;  %v1248_v22 = vmul.f32 %v2557_v6, %v1047_v1 }
 0x1a0   : > { %v1016_v40 = vpop.f32.mrf.mxu3  ;;  %v1306_v13 = vadd.f32 %v2559_v55, %v1277_v34  ;;  %v2697_v17 = vpop.eup %1844  ;;  %v1048_v30 = vmul.f32 %v979_v41, %v979_v41  ;;  %v1278_v11 = vmul.f32 %v2554_v59, %v979_v41  ;;  %v1383_v18 = vmul.f32 %v1841_v44, %v1327_v45 }
 0x1a1   : > { %v1017_v27 = vadd.f32 %v1016_v40, %v2609_v63  ;;  %v2700_v63 = vadd.f32 %v2577_v16, %v1160_v35  ;;  %v2703_v15 = vmul.f32 %v1103_v39, %v1045_v19  ;;  %v1384_v62 = vmul.f32 %v1843_v21, %v1328_v14 }
 0x1a2   : > { %v2706_v3 = vadd.f32 %v1304_v8, %v1246_v23  ;;  %v1105_v50 = vadd.f32 %v2568_v56, %v1076_v53  ;;  %v1077_v2 = vmul.f32 %v2561_v49, %v979_v41  ;;  %v1410_v54 = vsub.f32 2.0, %v1382_v43  ;;  %v905_v23 = vpop.f32.mrf.mxu0 }
 0x1a3   : > { %v1049_v58 = vmul.f32 %v1017_v27, %v1017_v27  ;;  %v1279_v37 = vmul.f32 %v2554_v59, %v1017_v27  ;;  %v2710_v48 = vpop.eup %1846  ;;  %v2712_v40 = vadd.f32 %v1305_v4, %v1247_v57  ;;  %v2715_v10 = vadd.f32 %v2577_v16, %v1162_v0 }
 0x1a4   : > { %v2717_v45 = vadd.f32 %v1306_v13, %v1248_v22  ;;  %v1163_v19 = vmul.f32 %v2570_v5, %v979_v41  ;;  %v1249_v14 = vmul.f32 %v2557_v6, %v1048_v30  ;;  %v1307_v34 = vadd.f32 %v2559_v55, %v1278_v11  ;;  %v830_v41 = vpop.permute.xlu1 %829 }
 0x1a5   : > { %v1078_v35 = vmul.f32 %v2561_v49, %v1017_v27  ;;  %v1411_v39 = vsub.f32 2.0, %v1383_v18  ;;  %v1250_v8 = vmul.f32 %v2557_v6, %v1049_v58  ;;  %v1308_v57 = vadd.f32 %v2559_v55, %v1279_v37  ;;  %v943_v18 = vpop.f32.mrf.mxu1 }
 0x1a6   : > { %v1412_v53 = vsub.f32 2.0, %v1384_v62  ;;  %v1437_v43 = vmul.f32 %v2600_v42, %v1409_v47  ;;  %1848 = vrcp.f32 %v2706_v3  ;;  %v2729_v4 = vmul.f32 %v1105_v50, %v1047_v1 }
 0x1a7   : > { %v1106_v0 = vadd.f32 %v2568_v56, %v1077_v2  ;;  %v1438_v22 = vmul.f32 %v2631_v61, %v1410_v54  ;;  %1850 = vrcp.f32 %v2712_v40  ;;  %v2735_v13 = vadd.f32 %v2577_v16, %v1163_v19  ;;  %v1495_v54 = vpop.permute.xlu0 %1494 }
 0x1a8   : > { %v1212_v11 = vadd.f32 %v2626_v20, %v2638_v12  ;;  %v906_v29 = vadd.f32 %v905_v23, %v830_v41  ;;  %v2739_v42 = vadd.f32 %v1307_v34, %v1249_v14  ;;  %v1107_v47 = vadd.f32 %v2568_v56, %v1078_v35  ;;  %v981_v14 = vpop.f32.mrf.mxu2 }
 0x1a9   : > { %3222 = vst [vmem:[#allocation6_spill] sm:$0xff] %v2735_v13  ;;  %v1164_v1 = vmul.f32 %v2570_v5, %v1017_v27  ;;  %v1439_v37 = vmul.f32 %v1841_v44, %v1411_v39  ;;  %1852 = vrcp.f32 %v2717_v45  ;;  %v2744_v61 = vadd.f32 %v1308_v57, %v1250_v8  ;;  %v1019_v8 = vpop.f32.mrf.mxu3 }
 0x1aa   : > { %v1440_v62 = vmul.f32 %v1843_v21, %v1412_v53  ;;  %v1465_v50 = vmul.f32 %v1437_v43, %v2592_v32  ;;  %v2747_v2 = vmul.f32 %v1106_v0, %v1048_v30  ;;  %v1466_v20 = vmul.f32 %v1438_v22, %v2604_v9 }
 0x1ab   : > { %v1079_v12 = vmul.f32 %v2561_v49, %v906_v29  ;;  %v944_v19 = vadd.f32 %v943_v18, %v830_v41  ;;  %v1213_v27 = vadd.f32 %v2657_v24, %v2662_v51  ;;  %v1050_v44 = vmul.f32 %v906_v29, %v906_v29 }
 0x1ac   : > { %3223 = vst [vmem:[#allocation7_spill] sm:$0xff] %v2747_v2  ;;  %v1165_v34 = vmul.f32 %v2570_v5, %v906_v29  ;;  %v1280_v35 = vmul.f32 %v2554_v59, %v906_v29  ;;  %v2755_v21 = vpop.eup %1848  ;;  %1854 = vrcp.f32 %v2739_v42  ;;  %v2758_v32 = vmul.f32 %v1107_v47, %v1049_v58 }
 0x1ad   : > { %v2761_v9 = vadd.f32 %v2577_v16, %v1164_v1  ;;  %v1467_v30 = vmul.f32 %v1439_v37, %v1212_v11  ;;  %v2763_v39 = vpop.eup %1850  ;;  %1856 = vrcp.f32 %v2744_v61  ;;  %v1468_v24 = vmul.f32 %v1440_v62, %v1213_v27 }
 0x1ae   : > { %3224 = vst [vmem:[#allocation8_spill] sm:$0xff] %v2758_v32  ;;  %v2766_v51 = vmul.f32 %v1495_v54, %v1465_v50  ;;  %v982_v23 = vadd.f32 %v981_v14, %v830_v41  ;;  %v2768_v57 = vmul.f32 %v1495_v54, %v1466_v20  ;;  %v1108_v53 = vadd.f32 %v2568_v56, %v1079_v12 }
 0x1af   : > { %3225 = vst [vmem:[#allocation9_spill] sm:$0xff] %v2761_v9  ;;  %v1051_v43 = vmul.f32 %v944_v19, %v944_v19  ;;  %v1281_v58 = vmul.f32 %v2554_v59, %v944_v19  ;;  %v2772_v0 = vpop.eup %1852  ;;  %v2775_v22 = vadd.f32 %v2577_v16, %v1165_v34  ;;  %v1251_v11 = vmul.f32 %v2557_v6, %v1050_v44 }
 0x1b0   : > { %v1309_v29 = vadd.f32 %v2559_v55, %v1280_v35  ;;  %v1080_v18 = vmul.f32 %v2561_v49, %v944_v19  ;;  %v2780_v47 = vmul.f32 %v1495_v54, %v1467_v30  ;;  %v1020_v1 = vadd.f32 %v1019_v8, %v830_v41  ;;  %v2800_v30 = vpop.permute.xlu1 %837 }
 0x1b1   : > { %3226 = vst [vmem:[#allocation10_spill] sm:$0xff] %v2775_v22  ;;  %v1385_v37 = vmul.f32 %v2660_v25, %v2613_v36  ;;  %v1386_v62 = vmul.f32 %v2697_v17, %v2648_v7  ;;  %v1052_v50 = vmul.f32 %v982_v23, %v982_v23  ;;  %v1282_v20 = vmul.f32 %v2554_v59, %v982_v23 }
 0x1b2   : > { %v1387_v12 = vmul.f32 %v2710_v48, %v2664_v31  ;;  %v1388_v14 = vmul.f32 %v2755_v21, %v2706_v3  ;;  %v2791_v27 = vpop.eup %1854  ;;  %v2793_v34 = vmul.f32 %v1495_v54, %v1468_v24  ;;  %v1166_v41 = vmul.f32 %v2570_v5, %v944_v19 }
 0x1b3   : > { %v1252_v36 = vmul.f32 %v2557_v6, %v1051_v43  ;;  %v1310_v35 = vadd.f32 %v2559_v55, %v1281_v58  ;;  %v2798_v7 = vpop.eup %1856  ;;  %v2802_v8 = vmul.f32 %v1108_v53, %v1050_v44  ;;  %v2804_v31 = vadd.f32 %v1309_v29, %v1251_v11 }
 0x1b4   : > { %v1109_v3 = vadd.f32 %v2568_v56, %v1080_v18  ;;  %v1081_v22 = vmul.f32 %v2561_v49, %v982_v23  ;;  %v1053_v54 = vmul.f32 %v1020_v1, %v1020_v1  ;;  %v1283_v24 = vmul.f32 %v2554_v59, %v1020_v1  ;;  %v2818_v18 = vpop.permute.xlu2 %833 }
 0x1b5   : > { %3227 = vst [vmem:[#allocation11_spill] sm:$0xff] %v2802_v8  ;;  %v1413_v19 = vsub.f32 2.0, %v1385_v37  ;;  %v1414_v9 = vsub.f32 2.0, %v1386_v62  ;;  %v1253_v32 = vmul.f32 %v2557_v6, %v1052_v50  ;;  %v1311_v58 = vadd.f32 %v2559_v55, %v1282_v20 }
 0x1b6   : > { %v1415_v13 = vsub.f32 2.0, %v1387_v12  ;;  %v1416_v2 = vsub.f32 2.0, %v1388_v14  ;;  %v2812_v44 = vadd.f32 %v2577_v16, %v1166_v41  ;;  %v2814_v53 = vadd.f32 %v1310_v35, %v1252_v36  ;;  %v908_v12 = vpop.f32.mrf.mxu0 }
 0x1b7   : > { %v1167_v11 = vmul.f32 %v2570_v5, %v982_v23  ;;  %v1082_v29 = vmul.f32 %v2561_v49, %v1020_v1  ;;  %v2820_v8 = vmul.f32 %v1109_v3, %v1051_v43  ;;  %v1110_v37 = vadd.f32 %v2568_v56, %v1081_v22 }
 0x1b8   : > { %v1168_v62 = vmul.f32 %v2570_v5, %v1020_v1  ;;  %v1215_v20 = vadd.f32 %v2635_v38, %v2646_v60  ;;  %v1254_v14 = vmul.f32 %v2557_v6, %v1053_v54  ;;  %v1312_v41 = vadd.f32 %v2559_v55, %v1283_v24 }
 0x1b9   : > { %v1441_v23 = vmul.f32 %v2660_v25, %v1413_v19  ;;  %v1442_v36 = vmul.f32 %v2697_v17, %v1414_v9  ;;  %1858 = vrcp.f32 %v2804_v31  ;;  %v2831_v43 = vadd.f32 %v1311_v58, %v1253_v32  ;;  %v946_v25 = vpop.f32.mrf.mxu1 }
 0x1ba   : > { %v1443_v22 = vmul.f32 %v2710_v48, %v1415_v13  ;;  %v1444_v1 = vmul.f32 %v2755_v21, %v1416_v2  ;;  %1860 = vrcp.f32 %v2814_v53  ;;  %v2837_v38 = vadd.f32 %v2577_v16, %v1167_v11 }
 0x1bb   : > { %v1111_v60 = vadd.f32 %v2568_v56, %v1082_v29  ;;  %v909_v35 = vadd.f32 %v908_v12, %v2818_v18  ;;  %v2841_v3 = vmul.f32 %v1110_v37, %v1052_v50  ;;  %v2844_v17 = vadd.f32 %v2577_v16, %v1168_v62  ;;  %v1499_v50 = vpop.permute.xlu1 %1498  ;;  %v984_v37 = vpop.f32.mrf.mxu2 }
 0x1bc   : > { %v1216_v48 = vadd.f32 %v2670_v33, %v2677_v46  ;;  %v1217_v13 = vadd.f32 %v2700_v63, %v2703_v15  ;;  %v2850_v2 = vadd.f32 %v1312_v41, %v1254_v14  ;;  %v1469_v21 = vmul.f32 %v1441_v23, %v2654_v28  ;;  %v2880_v23 = vpop.permute.xlu2 %841 }
 0x1bd   : > { %v1470_v32 = vmul.f32 %v1442_v36, %v1215_v20  ;;  %v1083_v9 = vmul.f32 %v2561_v49, %v909_v35  ;;  %1862 = vrcp.f32 %v2831_v43  ;;  %v947_v58 = vadd.f32 %v946_v25, %v2818_v18 }
 0x1be   : > { %v1471_v24 = vmul.f32 %v1443_v22, %v1216_v48  ;;  %v1472_v19 = vmul.f32 %v1444_v1, %v1217_v13  ;;  %v2856_v11 = vmul.f32 %v1111_v60, %v1053_v54  ;;  %v2858_v33 = vmul.f32 %v909_v35, %v909_v35  ;;  %v1022_v22 = vpop.f32.mrf.mxu3 }
 0x1bf   : > { %v1389_v46 = vmul.f32 %v2763_v39, %v2712_v40  ;;  %v1390_v28 = vmul.f32 %v2772_v0, %v2717_v45  ;;  %v2864_v63 = vpop.eup %1858  ;;  %v2867_v15 = vmul.f32 %v2570_v5, %v909_v35  ;;  %v1284_v29 = vmul.f32 %v2554_v59, %v909_v35 }
 0x1c0   : > { %v1391_v54 = vmul.f32 %v2791_v27, %v2739_v42  ;;  %v1392_v62 = vmul.f32 %v2798_v7, %v2744_v61  ;;  %v2874_v20 = vpop.eup %1860  ;;  %1864 = vrcp.f32 %v2850_v2  ;;  %v1525_v40 = vmul.f32 %v1499_v50, %v1469_v21 }
 0x1c1   : > { %v1526_v45 = vmul.f32 %v1499_v50, %v1470_v32  ;;  %v2878_v12 = vadd.f32 %v2568_v56, %v1083_v9  ;;  %v1527_v14 = vmul.f32 %v1499_v50, %v1471_v24  ;;  %v1528_v41 = vmul.f32 %v1499_v50, %v1472_v19 }
 0x1c2   : > { %v2882_v36 = vmul.f32 %v947_v58, %v947_v58  ;;  %v1084_v42 = vmul.f32 %v2561_v49, %v947_v58  ;;  %v1285_v61 = vmul.f32 %v2554_v59, %v947_v58  ;;  %v985_v1 = vadd.f32 %v984_v37, %v2818_v18 }
 0x1c3   : > { %v1417_v60 = vsub.f32 2.0, %v1389_v46  ;;  %v1418_v35 = vsub.f32 2.0, %v1390_v28  ;;  %v2887_v25 = vpop.eup %1862  ;;  %v2891_v48 = vmul.f32 %v2557_v6, %v2858_v33  ;;  %v2894_v13 = vadd.f32 %v2559_v55, %v1284_v29 }
 0x1c4   : > { %v1419_v21 = vsub.f32 2.0, %v1391_v54  ;;  %v1420_v32 = vsub.f32 2.0, %v1392_v62  ;;  %v1549_v9 = vadd.f32 %v1525_v40, %v2766_v51  ;;  %v1562_v50 = vadd.f32 %v1526_v45, %v2768_v57  ;;  %v911_v54 = vpop.f32.mrf.mxu0 }
 0x1c5   : > { %v2899_v24 = vmul.f32 %v2570_v5, %v947_v58  ;;  %v1023_v19 = vadd.f32 %v1022_v22, %v2818_v18  ;;  %v1575_v46 = vadd.f32 %v1527_v14, %v2780_v47  ;;  %v1588_v28 = vadd.f32 %v1528_v41, %v2793_v34  ;;  %v949_v14 = vpop.f32.mrf.mxu1 }
 0x1c6   : > { %v2905_v37 = vadd.f32 %v2568_v56, %v1084_v42  ;;  %v2909_v29 = vmul.f32 %v2557_v6, %v2882_v36  ;;  %v2911_v51 = vpop.eup %1864  ;;  %v2914_v57 = vadd.f32 %v2559_v55, %v1285_v61  ;;  %v2916_v58 = vmul.f32 %v985_v1, %v985_v1 }
 0x1c7   : > { %3228 = vst [vmem:[#allocation12_spill] sm:$0xff] %v2899_v24  ;;  %v1445_v18 = vmul.f32 %v2763_v39, %v1417_v60  ;;  %v1446_v47 = vmul.f32 %v2772_v0, %v1418_v35  ;;  %v1085_v34 = vmul.f32 %v2561_v49, %v985_v1  ;;  %v2922_v62 = vmul.f32 %v2570_v5, %v985_v1  ;;  %v3231_v60 = vld [vmem:[#allocation7_spill] sm:$0xff]  ;;  %v3232_v35 = vld [vmem:[#allocation6_spill] sm:$0xff]  ;;  %v1503_v24 = vpop.permute.xlu2 %1502 }
 0x1c8   : > { %v1447_v40 = vmul.f32 %v2791_v27, %v1419_v21  ;;  %v1448_v45 = vmul.f32 %v2798_v7, %v1420_v32  ;;  %v1286_v41 = vmul.f32 %v2554_v59, %v985_v1  ;;  %v1218_v42 = vadd.f32 %v2685_v26, %v2673_v52  ;;  %v3233_v21 = vld [vmem:[#allocation8_spill] sm:$0xff]  ;;  %v3234_v7 = vld [vmem:[#allocation9_spill] sm:$0xff] }
 0x1c9   : > { %3229 = vst [vmem:[#allocation13_spill] sm:$0xff] %v2922_v62  ;;  %v1219_v39 = vadd.f32 %v2715_v10, %v2729_v4  ;;  %v912_v0 = vadd.f32 %v911_v54, %v2800_v30  ;;  %v2932_v22 = vmul.f32 %v1023_v19, %v1023_v19  ;;  %v1086_v61 = vmul.f32 %v2561_v49, %v1023_v19  ;;  %v987_v62 = vpop.f32.mrf.mxu2 }
 0x1ca   : > { %v1220_v27 = vadd.f32 %v3232_v35, %v3231_v60  ;;  %v1221_v32 = vadd.f32 %v3234_v7, %v3233_v21  ;;  %v2941_v1 = vmul.f32 %v2557_v6, %v2916_v58  ;;  %v1473_v52 = vmul.f32 %v1445_v18, %v1218_v42 }
 0x1cb   : > { %3230 = vst [vmem:[#allocation14_spill] sm:$0xff] %v2932_v22  ;;  %v1474_v26 = vmul.f32 %v1446_v47, %v1219_v39  ;;  %v950_v10 = vadd.f32 %v949_v14, %v2800_v30  ;;  %v2945_v4 = vmul.f32 %v2570_v5, %v1023_v19  ;;  %v1287_v54 = vmul.f32 %v2554_v59, %v1023_v19  ;;  %v1025_v47 = vpop.f32.mrf.mxu3 }
 0x1cc   : > { %v1475_v16 = vmul.f32 %v1447_v40, %v1220_v27  ;;  %v1476_v60 = vmul.f32 %v1448_v45, %v1221_v32  ;;  %v2949_v35 = vadd.f32 %v2568_v56, %v1085_v34  ;;  %v2952_v21 = vadd.f32 %v2559_v55, %v1286_v41 }
 0x1cd   : > { %3235 = vst [vmem:[#allocation7_spill] sm:$0xff] %v2945_v4  ;;  %v1087_v7 = vmul.f32 %v2561_v49, %v912_v0  ;;  %v988_v18 = vadd.f32 %v987_v62, %v2800_v30  ;;  %v2957_v14 = vadd.f32 %v2568_v56, %v1086_v61  ;;  %v2961_v19 = vmul.f32 %v2557_v6, %v2932_v22 }
 0x1ce   : > { %v2963_v40 = vmul.f32 %v912_v0, %v912_v0  ;;  %v1288_v34 = vmul.f32 %v2554_v59, %v912_v0  ;;  %v1529_v45 = vmul.f32 %v1503_v24, %v1473_v52  ;;  %v1530_v42 = vmul.f32 %v1503_v24, %v1474_v26 }
 0x1cf   : > { %3236 = vst [vmem:[#allocation6_spill] sm:$0xff] %v2957_v14  ;;  %v2966_v41 = vmul.f32 %v950_v10, %v950_v10  ;;  %v1088_v39 = vmul.f32 %v2561_v49, %v950_v10  ;;  %v2970_v62 = vadd.f32 %v2559_v55, %v1287_v54  ;;  %v1531_v27 = vmul.f32 %v1503_v24, %v1475_v16 }
 0x1d0   : > { %3237 = vst [vmem:[#allocation8_spill] sm:$0xff] %v2963_v40  ;;  %v1532_v61 = vmul.f32 %v1503_v24, %v1476_v60  ;;  %v1289_v32 = vmul.f32 %v2554_v59, %v950_v10  ;;  %v2974_v4 = vadd.f32 %v2568_v56, %v1087_v7  ;;  %v2977_v14 = vmul.f32 %v2570_v5, %v912_v0 }
 0x1d1   : > { %3238 = vst [vmem:[#allocation9_spill] sm:$0xff] %v2966_v41  ;;  %v1089_v52 = vmul.f32 %v2561_v49, %v988_v18  ;;  %v1026_v26 = vadd.f32 %v1025_v47, %v2800_v30  ;;  %v2983_v22 = vmul.f32 %v2557_v6, %v2963_v40  ;;  %v2986_v54 = vadd.f32 %v2559_v55, %v1288_v34 }
 0x1d2   : > { %3239 = vst [vmem:[#allocation15_spill] sm:$0xff] %v2974_v4  ;;  %v2989_v16 = vmul.f32 %v2570_v5, %v950_v10  ;;  %v2991_v24 = vmul.f32 %v988_v18, %v988_v18  ;;  %v2993_v60 = vadd.f32 %v1549_v9, %v1529_v45  ;;  %v2995_v0 = vadd.f32 %v1562_v50, %v1530_v42  ;;  %v914_v45 = vpop.f32.mrf.mxu0 }
 0x1d3   : > { %3240 = vst [vmem:[#allocation16_spill] sm:$0xff] %v2977_v14  ;;  %v2998_v7 = vadd.f32 %v2568_v56, %v1088_v39  ;;  %v3002_v30 = vmul.f32 %v2557_v6, %v2966_v41  ;;  %v3004_v47 = vadd.f32 %v1575_v46, %v1531_v27  ;;  %v3006_v34 = vadd.f32 %v1588_v28, %v1532_v61  ;;  %v952_v28 = vpop.f32.mrf.mxu1  ;;  %v1028_v14 = vpop.f32.mrf.mxu3 }
 0x1d4   : > { %3241 = vst [vmem:[#allocation17_spill] sm:$0xff] %v2989_v16  ;;  %v3009_v10 = vadd.f32 %v2559_v55, %v1289_v32  ;;  %v1393_v9 = vmul.f32 %v2864_v63, %v2804_v31  ;;  %v3014_v50 = vadd.f32 %v2568_v56, %v1089_v52  ;;  %v3017_v42 = vmul.f32 %v2570_v5, %v988_v18  ;;  %v990_v52 = vpop.f32.mrf.mxu2 }
 0x1d5   : > { %3242 = vst [vmem:[#allocation18_spill] sm:$0xff] %v2991_v24  ;;  %v1290_v39 = vmul.f32 %v2554_v59, %v988_v18  ;;  %v1394_v46 = vmul.f32 %v2874_v20, %v2814_v53  ;;  %v3024_v27 = vmul.f32 %v2557_v6, %v2991_v24  ;;  %v3026_v61 = vmul.f32 %v1026_v26, %v1026_v26  ;;  %v3249_v24 = vld [vmem:[#allocation10_spill] sm:$0xff] }
 0x1d6   : > { %3243 = vst [vmem:[#allocation19_spill] sm:$0xff] %v2998_v7  ;;  %v1090_v31 = vmul.f32 %v2561_v49, %v1026_v26  ;;  %v1395_v32 = vmul.f32 %v2887_v25, %v2831_v43  ;;  %v1291_v18 = vmul.f32 %v2554_v59, %v1026_v26  ;;  %v1396_v53 = vmul.f32 %v2911_v51, %v2850_v2 }
 0x1d7   : > { %3244 = vst [vmem:[#allocation20_spill] sm:$0xff] %v3014_v50  ;;  %v915_v16 = vadd.f32 %v914_v45, %v2880_v23  ;;  %v3248_v50 = vld [vmem:[#allocation11_spill] sm:$0xff]  ;;  %v1223_v41 = vadd.f32 %v2812_v44, %v2820_v8  ;;  %v1421_v4 = vsub.f32 2.0, %v1393_v9  ;;  %v953_v43 = vadd.f32 %v952_v28, %v2880_v23 }
 0x1d8   : > { %3245 = vst [vmem:[#allocation21_spill] sm:$0xff] %v3017_v42  ;;  %v3032_v42 = vmul.f32 %v2570_v5, %v1026_v26  ;;  %v1222_v7 = vadd.f32 %v3249_v24, %v3248_v50  ;;  %v3044_v40 = vadd.f32 %v2559_v55, %v1290_v39  ;;  %v1224_v26 = vadd.f32 %v2837_v38, %v2841_v3 }
 0x1d9   : > { %3246 = vst [vmem:[#allocation22_spill] sm:$0xff] %v3026_v61  ;;  %v3049_v2 = vadd.f32 %v990_v52, %v2880_v23  ;;  %v3052_v45 = vadd.f32 %v2568_v56, %v1090_v31  ;;  %v3056_v24 = vmul.f32 %v2557_v6, %v3026_v61  ;;  %v1423_v8 = vsub.f32 2.0, %v1395_v32  ;;  %v1507_v61 = vpop.permute.xlu1 %1506 }
 0x1da   : > { %3247 = vst [vmem:[#allocation23_spill] sm:$0xff] %v3032_v42  ;;  %v1422_v42 = vsub.f32 2.0, %v1394_v46  ;;  %v3059_v44 = vadd.f32 %v1028_v14, %v2880_v23  ;;  %v1225_v9 = vadd.f32 %v2844_v17, %v2856_v11  ;;  %v1424_v50 = vsub.f32 2.0, %v1396_v53 }
 0x1db   : > { %3250 = vst [vmem:[#allocation11_spill] sm:$0xff] %v3052_v45  ;;  %v3063_v38 = vmul.f32 %v915_v16, %v915_v16  ;;  %v1292_v3 = vmul.f32 %v2554_v59, %v915_v16  ;;  %v3067_v39 = vadd.f32 %v2559_v55, %v1291_v18  ;;  %v1449_v46 = vmul.f32 %v2864_v63, %v1421_v4 }
 0x1dc   : > { %v3070_v28 = vmul.f32 %v953_v43, %v953_v43  ;;  %v1293_v31 = vmul.f32 %v2554_v59, %v953_v43  ;;  %v1450_v23 = vmul.f32 %v2874_v20, %v1422_v42  ;;  %v1091_v14 = vmul.f32 %v2561_v49, %v915_v16 }
 0x1dd   : > { %v3077_v17 = vmul.f32 %v3049_v2, %v3049_v2  ;;  %v1294_v11 = vmul.f32 %v2554_v59, %v3049_v2  ;;  %v1451_v32 = vmul.f32 %v2887_v25, %v1423_v8  ;;  %v3083_v52 = vmul.f32 %v2570_v5, %v915_v16 }
 0x1de   : > { %v3087_v63 = vmul.f32 %v3059_v44, %v3059_v44  ;;  %v1295_v20 = vmul.f32 %v2554_v59, %v3059_v44  ;;  %v1452_v4 = vmul.f32 %v2911_v51, %v1424_v50  ;;  %v1263_v42 = vmul.f32 %v2557_v6, %v3063_v38 }
 0x1df   : > { %v1321_v18 = vadd.f32 %v2559_v55, %v1292_v3  ;;  %v1341_v25 = vadd.f32 %v2894_v13, %v2891_v48  ;;  %v1477_v53 = vmul.f32 %v1449_v46, %v1222_v7  ;;  %v1264_v16 = vmul.f32 %v2557_v6, %v3070_v28 }
 0x1e0   : > { %v1322_v8 = vadd.f32 %v2559_v55, %v1293_v31  ;;  %v1342_v45 = vadd.f32 %v2914_v57, %v2909_v29  ;;  %v1478_v59 = vmul.f32 %v1450_v23, %v1223_v41  ;;  %v1265_v51 = vmul.f32 %v2557_v6, %v3077_v17 }
 0x1e1   : > { %v1323_v50 = vadd.f32 %v2559_v55, %v1294_v11  ;;  %v1343_v3 = vadd.f32 %v2952_v21, %v2941_v1  ;;  %v1120_v48 = vadd.f32 %v2568_v56, %v1091_v14  ;;  %v1266_v13 = vmul.f32 %v2557_v6, %v3087_v63 }
 0x1e2   : > { %v1324_v7 = vadd.f32 %v2559_v55, %v1295_v20  ;;  %v1344_v29 = vadd.f32 %v2970_v62, %v2961_v19  ;;  %v1479_v57 = vmul.f32 %v1451_v32, %v1224_v26  ;;  %v1480_v41 = vmul.f32 %v1452_v4, %v1225_v9  ;;  %v3251_v26 = vld [vmem:[#allocation5_spill] sm:$0xff]  ;;  %v3252_v20 = vld [vmem:[#allocation14_spill] sm:$0xff] }
 0x1e3   : > { %1866 = vrcp.f32 %v1341_v25  ;;  %v1349_v46 = vadd.f32 %v1321_v18, %v1263_v42  ;;  %v1092_v31 = vmul.f32 %v2561_v49, %v953_v43  ;;  %v1178_v23 = vmul.f32 %v2570_v5, %v953_v43  ;;  %v3253_v4 = vld [vmem:[#allocation6_spill] sm:$0xff]  ;;  %v3254_v18 = vld [vmem:[#allocation12_spill] sm:$0xff] }
 0x1e4   : > { %1868 = vrcp.f32 %v1342_v45  ;;  %v1350_v1 = vadd.f32 %v1322_v8, %v1264_v16  ;;  %v1533_v21 = vmul.f32 %v1507_v61, %v1477_v53  ;;  %v1534_v14 = vmul.f32 %v1507_v61, %v1478_v59 }
 0x1e5   : > { %1870 = vrcp.f32 %v1343_v3  ;;  %v1351_v11 = vadd.f32 %v1323_v50, %v1265_v51  ;;  %v1093_v6 = vmul.f32 %v2561_v49, %v3049_v2  ;;  %v1094_v55 = vmul.f32 %v2561_v49, %v3059_v44 }
 0x1e6   : > { %1872 = vrcp.f32 %v1344_v29  ;;  %v1352_v19 = vadd.f32 %v1324_v7, %v1266_v13  ;;  %v1140_v62 = vmul.f32 %v2878_v12, %v2858_v33  ;;  %v1141_v43 = vmul.f32 %v2905_v37, %v2882_v36  ;;  %v3255_v37 = vld [vmem:[#allocation13_spill] sm:$0xff] }
 0x1e7   : > { %v1198_v9 = vadd.f32 %v3251_v26, %v2867_v15  ;;  %1874 = vrcp.f32 %v1349_v46  ;;  %v1142_v32 = vmul.f32 %v2949_v35, %v2916_v58  ;;  %v1143_v42 = vmul.f32 %v3253_v4, %v3252_v20  ;;  %v3256_v58 = vld [vmem:[#allocation7_spill] sm:$0xff] }
 0x1e8   : > { %v1199_v49 = vadd.f32 %v3251_v26, %v3254_v18  ;;  %1876 = vrcp.f32 %v1350_v1  ;;  %v1535_v16 = vmul.f32 %v1507_v61, %v1479_v57  ;;  %v1536_v33 = vmul.f32 %v1507_v61, %v1480_v41 }
 0x1e9   : > { %v1867_v53 = vpop.eup %1866  ;;  %v1121_v12 = vadd.f32 %v2568_v56, %v1092_v31  ;;  %1878 = vrcp.f32 %v1351_v11  ;;  %v1122_v15 = vadd.f32 %v2568_v56, %v1093_v6  ;;  %v1200_v8 = vadd.f32 %v3251_v26, %v3255_v37  ;;  %v3257_v37 = vld [vmem:[#allocation8_spill] sm:$0xff] }
 0x1ea   : > { %v1869_v36 = vpop.eup %1868  ;;  %v1201_v35 = vadd.f32 %v3251_v26, %v3256_v58  ;;  %1880 = vrcp.f32 %v1352_v19  ;;  %v1179_v51 = vmul.f32 %v2570_v5, %v3049_v2  ;;  %v1123_v50 = vadd.f32 %v2568_v56, %v1094_v55 }
 0x1eb   : > { %v1871_v59 = vpop.eup %1870  ;;  %v1180_v61 = vmul.f32 %v2570_v5, %v3059_v44  ;;  %v1226_v13 = vadd.f32 %v1198_v9, %v1140_v62  ;;  %v1227_v57 = vadd.f32 %v1199_v49, %v1141_v43  ;;  %v3142_v41 = vadd.f32 %v1200_v8, %v1142_v32 }
 0x1ec   : > { %v1873_v7 = vpop.eup %1872  ;;  %v3144_v31 = vadd.f32 %v1201_v35, %v1143_v42  ;;  %v3147_v6 = vadd.f32 %v2993_v60, %v1533_v21  ;;  %v1397_v4 = vmul.f32 %v1867_v53, %v1341_v25  ;;  %v3150_v18 = vadd.f32 %v2995_v0, %v1534_v14  ;;  %v3261_v35 = vld [vmem:[#allocation18_spill] sm:$0xff] }
 0x1ed   : > { %v1875_v20 = vpop.eup %1874  ;;  %v1148_v56 = vmul.f32 %v1120_v48, %v3063_v38  ;;  %v1149_v2 = vmul.f32 %v1121_v12, %v3070_v28  ;;  %v1398_v44 = vmul.f32 %v1869_v36, %v1342_v45  ;;  %v3155_v55 = vadd.f32 %v3004_v47, %v1535_v16 }
 0x1ee   : > { %v1877_v5 = vpop.eup %1876  ;;  %v3158_v62 = vadd.f32 %v3006_v34, %v1536_v33  ;;  %v1150_v60 = vmul.f32 %v1122_v15, %v3077_v17  ;;  %v1399_v43 = vmul.f32 %v1871_v59, %v1343_v3  ;;  %v1151_v25 = vmul.f32 %v1123_v50, %v3087_v63  ;;  %v3263_v50 = vld [vmem:[#allocation22_spill] sm:$0xff] }
 0x1ef   : > { %v1879_v21 = vpop.eup %1878  ;;  %v1206_v0 = vadd.f32 %v3251_v26, %v3083_v52  ;;  %v1207_v38 = vadd.f32 %v3251_v26, %v1178_v23  ;;  %v1400_v48 = vmul.f32 %v1873_v7, %v1344_v29  ;;  %v1208_v45 = vadd.f32 %v3251_v26, %v1179_v51  ;;  %v3262_v51 = vld [vmem:[#allocation20_spill] sm:$0xff] }
 0x1f0   : > { %v1881_v28 = vpop.eup %1880  ;;  %v1209_v47 = vadd.f32 %v3251_v26, %v1180_v61  ;;  %v1405_v14 = vmul.f32 %v1875_v20, %v1349_v46  ;;  %v1425_v34 = vsub.f32 2.0, %v1397_v4  ;;  %v1406_v17 = vmul.f32 %v1877_v5, %v1350_v1  ;;  %v3264_v61 = vld [vmem:[#allocation11_spill] sm:$0xff] }
 0x1f1   : > { %v1234_v9 = vadd.f32 %v1206_v0, %v1148_v56  ;;  %v1235_v32 = vadd.f32 %v1207_v38, %v1149_v2  ;;  %v1426_v42 = vsub.f32 2.0, %v1398_v44  ;;  %v1407_v3 = vmul.f32 %v1879_v21, %v1351_v11  ;;  %v3265_v2 = vld [vmem:[#allocation16_spill] sm:$0xff] }
 0x1f2   : > { %v1345_v63 = vadd.f32 %v2986_v54, %v2983_v22  ;;  %v1346_v52 = vadd.f32 %v3009_v10, %v3002_v30  ;;  %v1427_v23 = vsub.f32 2.0, %v1399_v43  ;;  %v1408_v49 = vmul.f32 %v1881_v28, %v1352_v19  ;;  %v3258_v30 = vld [vmem:[#allocation15_spill] sm:$0xff] }
 0x1f3   : > { %v1347_v29 = vadd.f32 %v3044_v40, %v3024_v27  ;;  %v1348_v46 = vadd.f32 %v3067_v39, %v3056_v24  ;;  %v1428_v16 = vsub.f32 2.0, %v1400_v48  ;;  %v1236_v33 = vadd.f32 %v1208_v45, %v1150_v60  ;;  %v3259_v40 = vld [vmem:[#allocation9_spill] sm:$0xff]  ;;  %v3260_v27 = vld [vmem:[#allocation19_spill] sm:$0xff] }
 0x1f4   : > { %v1433_v12 = vsub.f32 2.0, %v1405_v14  ;;  %1882 = vrcp.f32 %v1345_v63  ;;  %v1453_v1 = vmul.f32 %v1867_v53, %v1425_v34  ;;  %v1237_v11 = vadd.f32 %v1209_v47, %v1151_v25  ;;  %v3266_v60 = vld [vmem:[#allocation17_spill] sm:$0xff]  ;;  %v1511_v25 = vpop.permute.xlu2 %1510  ;;  %v3268_v48 = vld [vmem:[#allocation23_spill] sm:$0xff] }
 0x1f5   : > { %v1434_v15 = vsub.f32 2.0, %v1406_v17  ;;  %1884 = vrcp.f32 %v1346_v52  ;;  %v1454_v22 = vmul.f32 %v1869_v36, %v1426_v42  ;;  %v1435_v54 = vsub.f32 2.0, %v1407_v3 }
 0x1f6   : > { %v1144_v10 = vmul.f32 %v3258_v30, %v3257_v37  ;;  %1886 = vrcp.f32 %v1347_v29  ;;  %v1455_v19 = vmul.f32 %v1871_v59, %v1427_v23  ;;  %v1436_v8 = vsub.f32 2.0, %v1408_v49 }
 0x1f7   : > { %v1145_v58 = vmul.f32 %v3260_v27, %v3259_v40  ;;  %1888 = vrcp.f32 %v1348_v46  ;;  %v1456_v24 = vmul.f32 %v1873_v7, %v1428_v16  ;;  %v1461_v39 = vmul.f32 %v1875_v20, %v1433_v12  ;;  %v3267_v7 = vld [vmem:[#allocation21_spill] sm:$0xff] }
 0x1f8   : > { %v1146_v53 = vmul.f32 %v3262_v51, %v3261_v35  ;;  %v1147_v4 = vmul.f32 %v3264_v61, %v3263_v50  ;;  %v1481_v36 = vmul.f32 %v1453_v1, %v1226_v13  ;;  %v1462_v56 = vmul.f32 %v1877_v5, %v1434_v15 }
 0x1f9   : > { %v1202_v44 = vadd.f32 %v3251_v26, %v3265_v2  ;;  %v1203_v59 = vadd.f32 %v3251_v26, %v3266_v60  ;;  %v1482_v0 = vmul.f32 %v1454_v22, %v1227_v57  ;;  %v1463_v38 = vmul.f32 %v1879_v21, %v1435_v54 }
 0x1fa   : > { %v1883_v43 = vpop.eup %1882  ;;  %v1204_v20 = vadd.f32 %v3251_v26, %v3267_v7  ;;  %v1205_v45 = vadd.f32 %v3251_v26, %v3268_v48  ;;  %v1483_v13 = vmul.f32 %v1455_v19, %v3142_v41  ;;  %v1464_v5 = vmul.f32 %v1881_v28, %v1436_v8  ;;  %v1519_v41 = vpop.permute.xlu1 %1518 }
 0x1fb   : > { %v1885_v47 = vpop.eup %1884  ;;  %v1230_v14 = vadd.f32 %v1202_v44, %v1144_v10  ;;  %v1401_v34 = vmul.f32 %v1883_v43, %v1345_v63  ;;  %v1484_v42 = vmul.f32 %v1456_v24, %v3144_v31  ;;  %v1489_v3 = vmul.f32 %v1461_v39, %v1234_v9  ;;  %v1515_v31 = vpop.permute.xlu0 %1514 }
 0x1fc   : > { %v1887_v17 = vpop.eup %1886  ;;  %v1231_v23 = vadd.f32 %v1203_v59, %v1145_v58  ;;  %v1402_v49 = vmul.f32 %v1885_v47, %v1346_v52  ;;  %v1537_v21 = vmul.f32 %v1511_v25, %v1481_v36  ;;  %v1490_v16 = vmul.f32 %v1462_v56, %v1235_v32 }
 0x1fd   : > { %v1889_v57 = vpop.eup %1888  ;;  %v1403_v12 = vmul.f32 %v1887_v17, %v1347_v29  ;;  %v1429_v1 = vsub.f32 2.0, %v1401_v34  ;;  %v1538_v15 = vmul.f32 %v1511_v25, %v1482_v0  ;;  %v1491_v22 = vmul.f32 %v1463_v38, %v1236_v33 }
 0x1fe   : > { %v1404_v26 = vmul.f32 %v1889_v57, %v1348_v46  ;;  %v1430_v54 = vsub.f32 2.0, %v1402_v49  ;;  %v1539_v37 = vmul.f32 %v1511_v25, %v1483_v13  ;;  %v1492_v28 = vmul.f32 %v1464_v5, %v1237_v11 }
 0x1ff   : > { %v1431_v30 = vsub.f32 2.0, %v1403_v12  ;;  %v1457_v63 = vmul.f32 %v1883_v43, %v1429_v1  ;;  %v1540_v10 = vmul.f32 %v1511_v25, %v1484_v42  ;;  %v1545_v19 = vmul.f32 %v1519_v41, %v1489_v3 }
 0x200   : > { %v1432_v9 = vsub.f32 2.0, %v1404_v26  ;;  %v1458_v8 = vmul.f32 %v1885_v47, %v1430_v54  ;;  %v1546_v52 = vmul.f32 %v1519_v41, %v1490_v16  ;;  %v1232_v40 = vadd.f32 %v1204_v20, %v1146_v53 }
 0x201   : > { %v1459_v27 = vmul.f32 %v1887_v17, %v1431_v30  ;;  %v1485_v32 = vmul.f32 %v1457_v63, %v1230_v14  ;;  %v1547_v29 = vmul.f32 %v1519_v41, %v1491_v22  ;;  %v1233_v58 = vadd.f32 %v1205_v45, %v1147_v4 }
 0x202   : > { %v1460_v24 = vmul.f32 %v1889_v57, %v1432_v9  ;;  %v1486_v33 = vmul.f32 %v1458_v8, %v1231_v23  ;;  %v1552_v46 = vadd.f32 %v3147_v6, %v1537_v21  ;;  %v1548_v39 = vmul.f32 %v1519_v41, %v1492_v28 }
 0x203   : > { %v1487_v35 = vmul.f32 %v1459_v27, %v1232_v40  ;;  %v1541_v11 = vmul.f32 %v1515_v31, %v1485_v32  ;;  %v1565_v51 = vadd.f32 %v3150_v18, %v1538_v15  ;;  %v1554_v50 = vsel %vm866_vm0, %v1545_v19, 0.0 }
 0x204   : > { %v1488_v61 = vmul.f32 %v1460_v24, %v1233_v58  ;;  %v1542_v36 = vmul.f32 %v1515_v31, %v1486_v33  ;;  %v1578_v56 = vadd.f32 %v3155_v55, %v1539_v37  ;;  %v1567_v53 = vsel %vm866_vm0, %v1546_v52, 0.0 }
 0x205   : > { %v1543_v2 = vmul.f32 %v1515_v31, %v1487_v35  ;;  %v1553_v44 = vadd.f32 %v1552_v46, %v1541_v11  ;;  %v1591_v4 = vadd.f32 %v3158_v62, %v1540_v10  ;;  %v1580_v60 = vsel %vm866_vm0, %v1547_v29, 0.0 }
 0x206   : > { %v1544_v6 = vmul.f32 %v1515_v31, %v1488_v61  ;;  %v1566_v59 = vadd.f32 %v1565_v51, %v1542_v36  ;;  %v1593_v43 = vsel %vm866_vm0, %v1548_v39, 0.0  ;;  %v1601_v1 = vstv %s1692_s6 }
 0x207   : > { %v1555_v25 = vadd.f32 %v1554_v50, %v1553_v44  ;;  %v1579_v18 = vadd.f32 %v1578_v56, %v1543_v2  ;;  %v1619_v30 = vlaneseq }
 0x208   : > { %v1568_v0 = vadd.f32 %v1567_v53, %v1566_v59  ;;  %v1592_v38 = vadd.f32 %v1591_v4, %v1544_v6 }
 0x209   : > { %v1556_v7 = vrot.slane %v1555_v25, 4  ;;  %v1581_v20 = vadd.f32 %v1580_v60, %v1579_v18  ;;  %vm1621_vm4 = vcmp.lt.s32.totalorder %v1619_v30, 512 }
 0x20a   : > { %v1569_v48 = vrot.slane %v1568_v0, 4  ;;  %v1594_v55 = vadd.f32 %v1593_v43, %v1592_v38 }
 0x20b   : > { %v1557_v45 = vadd.f32 %v1556_v7, %v1555_v25  ;;  %v1582_v47 = vrot.slane %v1581_v20, 4 }
 0x20c   : > { %v1570_v13 = vadd.f32 %v1569_v48, %v1568_v0  ;;  %v1595_v5 = vrot.slane %v1594_v55, 4 }
 0x20d   : > { %v1558_v62 = vrot.slane %v1557_v45, 2  ;;  %v1583_v14 = vadd.f32 %v1582_v47, %v1581_v20 }
 0x20e   : > { %v1571_v34 = vrot.slane %v1570_v13, 2  ;;  %v1596_v17 = vadd.f32 %v1595_v5, %v1594_v55 }
 0x20f   : > { %v1559_v42 = vadd.f32 %v1558_v62, %v1557_v45  ;;  %v1584_v3 = vrot.slane %v1583_v14, 2 }
 0x210   : > { %v1572_v23 = vadd.f32 %v1571_v34, %v1570_v13  ;;  %v1597_v49 = vrot.slane %v1596_v17, 2 }
 0x211   : > { %v1585_v57 = vadd.f32 %v1584_v3, %v1583_v14  ;;  %v1560_v21 = vrot.slane %v1559_v42, 1 }
 0x212   : > { %v1573_v16 = vrot.slane %v1572_v23, 1  ;;  %v1598_v12 = vadd.f32 %v1597_v49, %v1596_v17 }
 0x213   : > { %v1586_v15 = vrot.slane %v1585_v57, 1  ;;  %v1561_v37 = vadd.f32 %v1560_v21, %v1559_v42 }
 0x214   : > { %v1574_v22 = vadd.f32 %v1573_v16, %v1572_v23  ;;  %v1599_v26 = vrot.slane %v1598_v12, 1 }
 0x215   : > { %v1587_v54 = vadd.f32 %v1586_v15, %v1585_v57  ;;  %v1602_v9 = vadd.f32 %v1601_v1, %v1561_v37 }
 0x216   : > { %v1600_v41 = vadd.f32 %v1599_v26, %v1598_v12  ;;  %v1603_v28 = vadd.f32 %v1601_v1, %v1574_v22 }
 0x217   : > { %v1604_v63 = vadd.f32 %v1601_v1, %v1587_v54 }
 0x218   : > { %v1605_v10 = vadd.f32 %v1601_v1, %v1600_v41  ;;  %v1610_v19 = vrot.slane %v1603_v28, 7 }
 0x219   : > { %v1611_v31 = vrot.slane %v1604_v63, 6 }
 0x21a   : > { %v1612_v8 = vrot.slane %v1605_v10, 5  ;;  %v1614_v52 = vsel %vm1613_vm2, %v1602_v9, %v1610_v19 }
 0x21c   : > { %v1616_v40 = vsel %vm1615_vm3, %v1611_v31, %v1612_v8 }
 0x21d   : > { %v1617_v27 = vsel %vm866_vm0, %v1614_v52, %v1616_v40 }
 0x21e   : > { %1623 = vst.msk [vmem:[%s208_s10] sm:$0xf] %vm1621_vm4, %v1617_v27 }
 0x21f PF: > { %s15_s15 = sadd.s32 1, %s1922_s15  }
 0x220   : > { %p12_p7 = scmp.ge.s32.totalorder %s15_s15, 4  }
 0x222   :  { %14 = sbr.rel (!%p12_p7) target bundleno = 1 (0x1), region = 71 }
 0x227   :  { %1644 = vsyncpa [#allocation3], 1 }
 0x228   :  { %1646 = vsyncpa [#allocation3 + $0x1], 1 }

</bundles_post_ra>
